<compile_context>
chip_gen: v7x
topology: tpu7x:2x2x1
jax: 0.10.0
libtpu: 0.0.40
codegen_flags: <defaults>
</compile_context>

<pallas_src>
import jax
import jax.numpy as jnp
from jax.experimental import pallas as pl
from jax.experimental.pallas import tpu as pltpu

T_DIM = 25              # timesteps folded into the batch for fc0..fc2
CODE_DIM = 128          # fc0 in/out width
Z_DIM = 32              # true fc1/fc2/fc3 output width
ZP = 128                # lane-padded hidden width (lane-dense vregs / MXU cols)
C3 = T_DIM * Z_DIM      # 800 = logical fc3 input width
C3P = 896               # 7 * 128, lane-dense padding of C3
BN_EPS = 1e-5

# Row indices inside the packed (8, 128) f32 gamma/beta slab.
_G0, _BT0 = 0, 1
_G1, _BT1 = 2, 3
_G2, _BT2 = 4, 5
_G3, _BT3 = 6, 7


def _bn_relu(h, gamma, beta):
    """Train-mode BatchNorm1d over axis 0 (biased variance) + ReLU.

    For lane-dense (width % 128 == 0) layers the per-channel sum and
    sum-of-squares ride ONE bf16 ones-row MXU pass over the lane-concatenated
    [h, h*h]; the tiny final (B, 32) layer uses a plain sublane reduce.
    """
    n_rows, w = h.shape
    inv_n = jnp.float32(1.0 / n_rows)
    if w % 128 == 0:
        hcat = jnp.concatenate(
            [h.astype(jnp.bfloat16), (h * h).astype(jnp.bfloat16)], axis=-1)
        ones = jnp.ones((1, n_rows), jnp.bfloat16)
        stats = jnp.dot(ones, hcat, preferred_element_type=jnp.float32) * inv_n
        mean, ex2 = stats[:, :w], stats[:, w:]
    else:
        mean = jnp.sum(h, axis=0, keepdims=True) * inv_n
        ex2 = jnp.sum(h * h, axis=0, keepdims=True) * inv_n
    var = jnp.maximum(ex2 - mean * mean, 0.0)       # guard one-pass cancellation
    hn = (h - mean) * jax.lax.rsqrt(var + BN_EPS)
    return jnp.maximum(hn * gamma + beta, 0.0)


def fused_mlp_kernel(x_ref, w012_ref, w3w_ref, vec_ref, mask_ref, rsel_ref,
                     ssel_ref, o_ref):
    """Whole forward pass in VMEM; fc3 + the torch reshape done reshape-free:

      p[n, t*Z + o] = sum_j h2[n, j] * W3[t*Z + j, o]     (wide bf16 matmul)
      g[n, o]       = p[n, (n % T)*Z + o]                 (mask * p, fold matmul)
      h3[b, o]      = sum_{n // T == b} g[n, o]           (segment-sum matmul)

    Linear biases are dropped: they cancel exactly under train-mode BN.
    """
    # --- fc0 + bn0 + relu (128 -> 128) ---
    h = jnp.dot(x_ref[...], w012_ref[0], preferred_element_type=jnp.float32)
    h = _bn_relu(h, vec_ref[_G0:_G0 + 1, :], vec_ref[_BT0:_BT0 + 1, :])

    # --- fc1 + bn1 + relu (128 -> 32, lane-padded to 128) ---
    h = jnp.dot(h.astype(jnp.bfloat16), w012_ref[1],
                preferred_element_type=jnp.float32)
    h = _bn_relu(h, vec_ref[_G1:_G1 + 1, :], vec_ref[_BT1:_BT1 + 1, :])

    # --- fc2 + bn2 + relu (32 -> 32, lane-padded to 128) ---
    h = jnp.dot(h.astype(jnp.bfloat16), w012_ref[2],
                preferred_element_type=jnp.float32)
    h = _bn_relu(h, vec_ref[_G2:_G2 + 1, :], vec_ref[_BT2:_BT2 + 1, :])

    # --- fc3 over the fused (t, z) axis (torch reshape folded in) ---
    p = jnp.dot(h.astype(jnp.bfloat16), w3w_ref[...],
                preferred_element_type=jnp.float32)             # (N, C3P) f32
    pm = p.astype(jnp.bfloat16) * mask_ref[...]                 # keep own-timestep block
    g = jnp.dot(pm, rsel_ref[...],
                preferred_element_type=jnp.float32)             # (N, Z): pure selection
    h3 = jnp.dot(ssel_ref[...], g.astype(jnp.bfloat16),
                 preferred_element_type=jnp.float32)            # (B, Z): segment sum

    # --- bn3 + relu ---
    o_ref[...] = _bn_relu(h3, vec_ref[_G3:_G3 + 1, 0:Z_DIM],
                          vec_ref[_BT3:_BT3 + 1, 0:Z_DIM])


# ----------------------------------------------------------------------------
# Parameter initialization / packing
# ----------------------------------------------------------------------------
def init_raw_params(key):
    """Deterministic synthetic parameters (logical PyTorch layout, W as (in, out))."""
    ks = jax.random.split(key, 8)

    def lin(kw, kb, fan_in, fan_out):
        w = (jax.random.normal(kw, (fan_in, fan_out), jnp.float32)
             / jnp.sqrt(jnp.float32(fan_in)))
        b = 0.01 * jax.random.normal(kb, (fan_out,), jnp.float32)
        return w, b

    def bn(kg, dim):
        g = 1.0 + 0.05 * jax.random.normal(kg, (dim,), jnp.float32)
        beta = 0.02 * jax.random.normal(jax.random.fold_in(kg, 1), (dim,), jnp.float32)
        return g, beta

    p = {}
    p["w0"], p["b0"] = lin(ks[0], ks[1], CODE_DIM, CODE_DIM)
    p["g0"], p["bt0"] = bn(ks[2], CODE_DIM)
    p["w1"], p["b1"] = lin(ks[3], ks[4], CODE_DIM, Z_DIM)
    p["g1"], p["bt1"] = bn(ks[5], Z_DIM)
    p["w2"], p["b2"] = lin(ks[6], ks[7], Z_DIM, Z_DIM)
    p["g2"], p["bt2"] = bn(jax.random.fold_in(key, 100), Z_DIM)
    p["w3"], p["b3"] = lin(jax.random.fold_in(key, 200),
                           jax.random.fold_in(key, 201), T_DIM * Z_DIM, Z_DIM)
    p["g3"], p["bt3"] = bn(jax.random.fold_in(key, 300), Z_DIM)
    return p


def pack_params(raw):
    """Lane-pad 32 -> 128 / 800 -> 896, cast weights to bf16, pack gamma/beta.

    Padding is exact: padded weight rows/cols and padded gamma/beta are zero, so
    padded lanes stay identically 0 through every bn+relu and never leak.
    Linear biases are intentionally NOT packed (they cancel under train-mode BN).
    """
    w1p = jnp.zeros((CODE_DIM, ZP), jnp.float32).at[:, :Z_DIM].set(raw["w1"])
    w2p = jnp.zeros((ZP, ZP), jnp.float32).at[:Z_DIM, :Z_DIM].set(raw["w2"])
    w012 = jnp.stack([raw["w0"], w1p, w2p]).astype(jnp.bfloat16)      # (3,128,128)

    # w3 is (T*Z, Z) with rows ordered (t, j).  Rearrange so
    # w3wide[j, t*Z + o] = w3[t*Z + j, o]; zero-pad to 128 sublanes x 896 lanes.
    w3r = raw["w3"].reshape(T_DIM, Z_DIM, Z_DIM)                      # [t, j, o]
    w3w = jnp.transpose(w3r, (1, 0, 2)).reshape(Z_DIM, C3)            # [j, t*Z+o]
    w3wide = (jnp.zeros((ZP, C3P), jnp.float32)
              .at[:Z_DIM, :C3].set(w3w)
              .astype(jnp.bfloat16))                                  # (128, 896)

    def pad128(v):
        return jnp.zeros((ZP,), jnp.float32).at[:v.shape[0]].set(v)

    vecs = jnp.stack([pad128(raw["g0"]), pad128(raw["bt0"]),
                      pad128(raw["g1"]), pad128(raw["bt1"]),
                      pad128(raw["g2"]), pad128(raw["bt2"]),
                      pad128(raw["g3"]), pad128(raw["bt3"])])         # (8, 128)
    return {"w012": w012, "w3wide": w3wide, "vecs": vecs}


def make_selectors(n_rows):
    """Host-precomputed 0/1 bf16 selection slabs (bf16-exact), built once."""
    assert n_rows % T_DIM == 0
    bsz = n_rows // T_DIM
    t_of_row = jnp.arange(n_rows) % T_DIM                                   # (N,)
    col = jnp.arange(C3P)
    # mask[n, c] = 1 iff column block c // Z is row n's own timestep.
    # Pad columns (block >= T_DIM) are automatically 0.
    mask = (t_of_row[:, None] == (col // Z_DIM)[None, :]).astype(jnp.bfloat16)
    # r_sel[c, o] = 1 iff c % Z == o (zeroed on pad columns).
    r_sel = ((col[:, None] % Z_DIM) == jnp.arange(Z_DIM)[None, :])
    r_sel = jnp.where(col[:, None] < C3, r_sel, False).astype(jnp.bfloat16)
    # s_sel[b, n] = 1 iff row n belongs to batch element b.
    row_b = jnp.arange(n_rows) // T_DIM
    s_sel = (jnp.arange(bsz)[:, None] == row_b[None, :]).astype(jnp.bfloat16)
    return {"mask": mask, "r_sel": r_sel, "s_sel": s_sel}


# ----------------------------------------------------------------------------
# Forward
# ----------------------------------------------------------------------------
@jax.jit
def latent_mlp_concat_forward(x, params, sel):
    n = x.shape[0]
    assert n % T_DIM == 0
    bsz = n // T_DIM

    x_bf = x.astype(jnp.bfloat16)                      # halve the N-scaled DMA

    flops = 2 * n * CODE_DIM * ZP * 3                  # fc0, fc1, fc2 (lane-padded)
    flops += 2 * n * ZP * C3P                          # fc3 wide projection
    flops += 2 * n * C3P * Z_DIM                       # lane-block fold (pm @ r_sel)
    flops += 2 * bsz * n * Z_DIM                       # segment sum     (s_sel @ g)
    flops += 3 * (2 * n * 2 * ZP) + 4 * bsz * Z_DIM    # fused BN stats
    flops += n * C3P                                   # mask multiply
    bytes_accessed = (x_bf.size * 2 + params["w012"].size * 2
                      + params["w3wide"].size * 2 + params["vecs"].size * 4
                      + sel["mask"].size * 2 + sel["r_sel"].size * 2
                      + sel["s_sel"].size * 2 + bsz * Z_DIM * 4)
    cost = pl.CostEstimate(flops=flops, transcendentals=3 * ZP + Z_DIM,
                           bytes_accessed=bytes_accessed)

    vmem = pl.BlockSpec(memory_space=pltpu.MemorySpace.VMEM)
    return pl.pallas_call(
        fused_mlp_kernel,
        out_shape=jax.ShapeDtypeStruct((bsz, Z_DIM), jnp.float32),
        in_specs=[vmem] * 7,
        out_specs=vmem,
        cost_estimate=cost,
    )(x_bf, params["w012"], params["w3wide"], params["vecs"],
      sel["mask"], sel["r_sel"], sel["s_sel"])


# ----------------------------------------------------------------------------
# Pure-JAX reference (PyTorch semantics; same bf16 matmul rounding) for a check
# ----------------------------------------------------------------------------
def _ref_bn_relu(h, g, bt):
    mean = jnp.mean(h, axis=0, keepdims=True)
    var = jnp.mean((h - mean) ** 2, axis=0, keepdims=True)
    return jnp.maximum((h - mean) * jax.lax.rsqrt(var + BN_EPS) * g + bt, 0.0)


def reference_forward(x, raw):
    def mm(a, w):
        return jnp.dot(a.astype(jnp.bfloat16), w.astype(jnp.bfloat16),
                       preferred_element_type=jnp.float32)
    h = _ref_bn_relu(mm(x, raw["w0"]) + raw["b0"], raw["g0"], raw["bt0"])
    h = _ref_bn_relu(mm(h, raw["w1"]) + raw["b1"], raw["g1"], raw["bt1"])
    h = _ref_bn_relu(mm(h, raw["w2"]) + raw["b2"], raw["g2"], raw["bt2"])
    h = h.reshape(-1, T_DIM * Z_DIM)
    return _ref_bn_relu(mm(h, raw["w3"]) + raw["b3"], raw["g3"], raw["bt3"])


if __name__ == "__main__":
    key = jax.random.PRNGKey(0)
    k_x, k_p = jax.random.split(key)

    BATCH = 4
    N = BATCH * T_DIM                       # 100 rows of (code_dim,) latents
    x = jax.random.normal(k_x, (N, CODE_DIM), jnp.float32)

    raw = init_raw_params(k_p)
    params = pack_params(raw)
    sel = make_selectors(N)

    out = latent_mlp_concat_forward(x, params, sel)
    out = jax.block_until_ready(out)

    assert out.shape == (BATCH, Z_DIM), out.shape
    assert bool(jnp.all(jnp.isfinite(out)))
    ref = reference_forward(x, raw)
    assert bool(jnp.allclose(out, ref, atol=0.1, rtol=0.1)), (
        float(jnp.max(jnp.abs(out - ref))))
    print("KERNEL_OK")
</pallas_src>

<mosaic_0001>
module attributes {stable_mosaic.version = 11 : i64} {
  func.func @fused_mlp_kernel(%arg0: memref<100x128xbf16, #tpu.memory_space<vmem>>, %arg1: memref<3x128x128xbf16, #tpu.memory_space<vmem>>, %arg2: memref<128x896xbf16, #tpu.memory_space<vmem>>, %arg3: memref<8x128xf32, #tpu.memory_space<vmem>>, %arg4: memref<100x896xbf16, #tpu.memory_space<vmem>>, %arg5: memref<896x32xbf16, #tpu.memory_space<vmem>>, %arg6: memref<4x100xbf16, #tpu.memory_space<vmem>>, %arg7: memref<4x32xf32, #tpu.memory_space<vmem>>) attributes {dimension_semantics = [], scalar_prefetch = 0 : i64, scratch_operands = 0 : i64, tpu.core_type = #tpu.core_type<tc>} {
    %c0 = arith.constant 0 : index
    %c0_0 = arith.constant 0 : index
    %0 = vector.load %arg0[%c0, %c0_0] : memref<100x128xbf16, #tpu.memory_space<vmem>>, vector<100x128xbf16>
    %c0_1 = arith.constant 0 : index
    %c0_2 = arith.constant 0 : index
    %c0_3 = arith.constant 0 : index
    %1 = vector.load %arg1[%c0_1, %c0_2, %c0_3] : memref<3x128x128xbf16, #tpu.memory_space<vmem>>, vector<1x128x128xbf16>
    %2 = vector.shape_cast %1 : vector<1x128x128xbf16> to vector<128x128xbf16>
    %cst = arith.constant dense<0.000000e+00> : vector<100x128xf32>
    %3 = tpu.matmul %0, %2, %cst {dimension_numbers = #tpu.dot_dimension_numbers<[1], [0], [0], [1], [0, 0, 1, 1], [], []>} : vector<100x128xbf16>, vector<128x128xbf16>, vector<100x128xf32> -> vector<100x128xf32>
    %c0_4 = arith.constant 0 : index
    %c0_5 = arith.constant 0 : index
    %4 = vector.load %arg3[%c0_4, %c0_5] : memref<8x128xf32, #tpu.memory_space<vmem>>, vector<1x128xf32>
    %c1 = arith.constant 1 : index
    %c0_6 = arith.constant 0 : index
    %5 = vector.load %arg3[%c1, %c0_6] : memref<8x128xf32, #tpu.memory_space<vmem>>, vector<1x128xf32>
    %6 = arith.truncf %3 : vector<100x128xf32> to vector<100x128xbf16>
    %7 = arith.mulf %3, %3 : vector<100x128xf32>
    %8 = arith.truncf %7 : vector<100x128xf32> to vector<100x128xbf16>
    %9 = tpu.concatenate %6, %8 in 1 : vector<100x128xbf16>, vector<100x128xbf16> -> vector<100x256xbf16>
    %cst_7 = arith.constant 1.000000e+00 : bf16
    %10 = vector.broadcast %cst_7 : bf16 to vector<1x100xbf16>
    %cst_8 = arith.constant dense<0.000000e+00> : vector<1x256xf32>
    %11 = tpu.matmul %10, %9, %cst_8 {dimension_numbers = #tpu.dot_dimension_numbers<[1], [0], [0], [1], [0, 0, 1, 1], [], []>} : vector<1x100xbf16>, vector<100x256xbf16>, vector<1x256xf32> -> vector<1x256xf32>
    %cst_9 = arith.constant 0.00999999977 : f32
    %12 = vector.broadcast %cst_9 : f32 to vector<1x256xf32>
    %13 = arith.mulf %11, %12 : vector<1x256xf32>
    %14 = vector.extract_strided_slice %13 {offsets = [0, 0], sizes = [1, 128], strides = [1, 1]} : vector<1x256xf32> to vector<1x128xf32>
    %15 = vector.extract_strided_slice %13 {offsets = [0, 128], sizes = [1, 128], strides = [1, 1]} : vector<1x256xf32> to vector<1x128xf32>
    %16 = arith.mulf %14, %14 : vector<1x128xf32>
    %17 = arith.subf %15, %16 : vector<1x128xf32>
    %cst_10 = arith.constant 0.000000e+00 : f32
    %18 = vector.broadcast %cst_10 : f32 to vector<1x128xf32>
    %19 = arith.maximumf %17, %18 : vector<1x128xf32>
    %20 = vector.broadcast %14 : vector<1x128xf32> to vector<100x128xf32>
    %21 = arith.subf %3, %20 : vector<100x128xf32>
    %cst_11 = arith.constant 9.99999974E-6 : f32
    %22 = vector.broadcast %cst_11 : f32 to vector<1x128xf32>
    %23 = arith.addf %19, %22 : vector<1x128xf32>
    %24 = math.rsqrt %23 : vector<1x128xf32>
    %25 = vector.broadcast %24 : vector<1x128xf32> to vector<100x128xf32>
    %26 = arith.mulf %21, %25 : vector<100x128xf32>
    %27 = vector.broadcast %4 : vector<1x128xf32> to vector<100x128xf32>
    %28 = arith.mulf %26, %27 : vector<100x128xf32>
    %29 = vector.broadcast %5 : vector<1x128xf32> to vector<100x128xf32>
    %30 = arith.addf %28, %29 : vector<100x128xf32>
    %cst_12 = arith.constant 0.000000e+00 : f32
    %31 = vector.broadcast %cst_12 : f32 to vector<100x128xf32>
    %32 = arith.maximumf %30, %31 : vector<100x128xf32>
    %33 = arith.truncf %32 : vector<100x128xf32> to vector<100x128xbf16>
    %c1_13 = arith.constant 1 : index
    %c0_14 = arith.constant 0 : index
    %c0_15 = arith.constant 0 : index
    %34 = vector.load %arg1[%c1_13, %c0_14, %c0_15] : memref<3x128x128xbf16, #tpu.memory_space<vmem>>, vector<1x128x128xbf16>
    %35 = vector.shape_cast %34 : vector<1x128x128xbf16> to vector<128x128xbf16>
    %cst_16 = arith.constant dense<0.000000e+00> : vector<100x128xf32>
    %36 = tpu.matmul %33, %35, %cst_16 {dimension_numbers = #tpu.dot_dimension_numbers<[1], [0], [0], [1], [0, 0, 1, 1], [], []>} : vector<100x128xbf16>, vector<128x128xbf16>, vector<100x128xf32> -> vector<100x128xf32>
    %c2 = arith.constant 2 : index
    %c0_17 = arith.constant 0 : index
    %37 = vector.load %arg3[%c2, %c0_17] : memref<8x128xf32, #tpu.memory_space<vmem>>, vector<1x128xf32>
    %c3 = arith.constant 3 : index
    %c0_18 = arith.constant 0 : index
    %38 = vector.load %arg3[%c3, %c0_18] : memref<8x128xf32, #tpu.memory_space<vmem>>, vector<1x128xf32>
    %39 = arith.truncf %36 : vector<100x128xf32> to vector<100x128xbf16>
    %40 = arith.mulf %36, %36 : vector<100x128xf32>
    %41 = arith.truncf %40 : vector<100x128xf32> to vector<100x128xbf16>
    %42 = tpu.concatenate %39, %41 in 1 : vector<100x128xbf16>, vector<100x128xbf16> -> vector<100x256xbf16>
    %cst_19 = arith.constant 1.000000e+00 : bf16
    %43 = vector.broadcast %cst_19 : bf16 to vector<1x100xbf16>
    %cst_20 = arith.constant dense<0.000000e+00> : vector<1x256xf32>
    %44 = tpu.matmul %43, %42, %cst_20 {dimension_numbers = #tpu.dot_dimension_numbers<[1], [0], [0], [1], [0, 0, 1, 1], [], []>} : vector<1x100xbf16>, vector<100x256xbf16>, vector<1x256xf32> -> vector<1x256xf32>
    %cst_21 = arith.constant 0.00999999977 : f32
    %45 = vector.broadcast %cst_21 : f32 to vector<1x256xf32>
    %46 = arith.mulf %44, %45 : vector<1x256xf32>
    %47 = vector.extract_strided_slice %46 {offsets = [0, 0], sizes = [1, 128], strides = [1, 1]} : vector<1x256xf32> to vector<1x128xf32>
    %48 = vector.extract_strided_slice %46 {offsets = [0, 128], sizes = [1, 128], strides = [1, 1]} : vector<1x256xf32> to vector<1x128xf32>
    %49 = arith.mulf %47, %47 : vector<1x128xf32>
    %50 = arith.subf %48, %49 : vector<1x128xf32>
    %cst_22 = arith.constant 0.000000e+00 : f32
    %51 = vector.broadcast %cst_22 : f32 to vector<1x128xf32>
    %52 = arith.maximumf %50, %51 : vector<1x128xf32>
    %53 = vector.broadcast %47 : vector<1x128xf32> to vector<100x128xf32>
    %54 = arith.subf %36, %53 : vector<100x128xf32>
    %cst_23 = arith.constant 9.99999974E-6 : f32
    %55 = vector.broadcast %cst_23 : f32 to vector<1x128xf32>
    %56 = arith.addf %52, %55 : vector<1x128xf32>
    %57 = math.rsqrt %56 : vector<1x128xf32>
    %58 = vector.broadcast %57 : vector<1x128xf32> to vector<100x128xf32>
    %59 = arith.mulf %54, %58 : vector<100x128xf32>
    %60 = vector.broadcast %37 : vector<1x128xf32> to vector<100x128xf32>
    %61 = arith.mulf %59, %60 : vector<100x128xf32>
    %62 = vector.broadcast %38 : vector<1x128xf32> to vector<100x128xf32>
    %63 = arith.addf %61, %62 : vector<100x128xf32>
    %cst_24 = arith.constant 0.000000e+00 : f32
    %64 = vector.broadcast %cst_24 : f32 to vector<100x128xf32>
    %65 = arith.maximumf %63, %64 : vector<100x128xf32>
    %66 = arith.truncf %65 : vector<100x128xf32> to vector<100x128xbf16>
    %c2_25 = arith.constant 2 : index
    %c0_26 = arith.constant 0 : index
    %c0_27 = arith.constant 0 : index
    %67 = vector.load %arg1[%c2_25, %c0_26, %c0_27] : memref<3x128x128xbf16, #tpu.memory_space<vmem>>, vector<1x128x128xbf16>
    %68 = vector.shape_cast %67 : vector<1x128x128xbf16> to vector<128x128xbf16>
    %cst_28 = arith.constant dense<0.000000e+00> : vector<100x128xf32>
    %69 = tpu.matmul %66, %68, %cst_28 {dimension_numbers = #tpu.dot_dimension_numbers<[1], [0], [0], [1], [0, 0, 1, 1], [], []>} : vector<100x128xbf16>, vector<128x128xbf16>, vector<100x128xf32> -> vector<100x128xf32>
    %c4 = arith.constant 4 : index
    %c0_29 = arith.constant 0 : index
    %70 = vector.load %arg3[%c4, %c0_29] : memref<8x128xf32, #tpu.memory_space<vmem>>, vector<1x128xf32>
    %c5 = arith.constant 5 : index
    %c0_30 = arith.constant 0 : index
    %71 = vector.load %arg3[%c5, %c0_30] : memref<8x128xf32, #tpu.memory_space<vmem>>, vector<1x128xf32>
    %72 = arith.truncf %69 : vector<100x128xf32> to vector<100x128xbf16>
    %73 = arith.mulf %69, %69 : vector<100x128xf32>
    %74 = arith.truncf %73 : vector<100x128xf32> to vector<100x128xbf16>
    %75 = tpu.concatenate %72, %74 in 1 : vector<100x128xbf16>, vector<100x128xbf16> -> vector<100x256xbf16>
    %cst_31 = arith.constant 1.000000e+00 : bf16
    %76 = vector.broadcast %cst_31 : bf16 to vector<1x100xbf16>
    %cst_32 = arith.constant dense<0.000000e+00> : vector<1x256xf32>
    %77 = tpu.matmul %76, %75, %cst_32 {dimension_numbers = #tpu.dot_dimension_numbers<[1], [0], [0], [1], [0, 0, 1, 1], [], []>} : vector<1x100xbf16>, vector<100x256xbf16>, vector<1x256xf32> -> vector<1x256xf32>
    %cst_33 = arith.constant 0.00999999977 : f32
    %78 = vector.broadcast %cst_33 : f32 to vector<1x256xf32>
    %79 = arith.mulf %77, %78 : vector<1x256xf32>
    %80 = vector.extract_strided_slice %79 {offsets = [0, 0], sizes = [1, 128], strides = [1, 1]} : vector<1x256xf32> to vector<1x128xf32>
    %81 = vector.extract_strided_slice %79 {offsets = [0, 128], sizes = [1, 128], strides = [1, 1]} : vector<1x256xf32> to vector<1x128xf32>
    %82 = arith.mulf %80, %80 : vector<1x128xf32>
    %83 = arith.subf %81, %82 : vector<1x128xf32>
    %cst_34 = arith.constant 0.000000e+00 : f32
    %84 = vector.broadcast %cst_34 : f32 to vector<1x128xf32>
    %85 = arith.maximumf %83, %84 : vector<1x128xf32>
    %86 = vector.broadcast %80 : vector<1x128xf32> to vector<100x128xf32>
    %87 = arith.subf %69, %86 : vector<100x128xf32>
    %cst_35 = arith.constant 9.99999974E-6 : f32
    %88 = vector.broadcast %cst_35 : f32 to vector<1x128xf32>
    %89 = arith.addf %85, %88 : vector<1x128xf32>
    %90 = math.rsqrt %89 : vector<1x128xf32>
    %91 = vector.broadcast %90 : vector<1x128xf32> to vector<100x128xf32>
    %92 = arith.mulf %87, %91 : vector<100x128xf32>
    %93 = vector.broadcast %70 : vector<1x128xf32> to vector<100x128xf32>
    %94 = arith.mulf %92, %93 : vector<100x128xf32>
    %95 = vector.broadcast %71 : vector<1x128xf32> to vector<100x128xf32>
    %96 = arith.addf %94, %95 : vector<100x128xf32>
    %cst_36 = arith.constant 0.000000e+00 : f32
    %97 = vector.broadcast %cst_36 : f32 to vector<100x128xf32>
    %98 = arith.maximumf %96, %97 : vector<100x128xf32>
    %99 = arith.truncf %98 : vector<100x128xf32> to vector<100x128xbf16>
    %c0_37 = arith.constant 0 : index
    %c0_38 = arith.constant 0 : index
    %100 = vector.load %arg2[%c0_37, %c0_38] : memref<128x896xbf16, #tpu.memory_space<vmem>>, vector<128x896xbf16>
    %cst_39 = arith.constant dense<0.000000e+00> : vector<100x896xf32>
    %101 = tpu.matmul %99, %100, %cst_39 {dimension_numbers = #tpu.dot_dimension_numbers<[1], [0], [0], [1], [0, 0, 1, 1], [], []>} : vector<100x128xbf16>, vector<128x896xbf16>, vector<100x896xf32> -> vector<100x896xf32>
    %102 = arith.truncf %101 : vector<100x896xf32> to vector<100x896xbf16>
    %c0_40 = arith.constant 0 : index
    %c0_41 = arith.constant 0 : index
    %103 = vector.load %arg4[%c0_40, %c0_41] : memref<100x896xbf16, #tpu.memory_space<vmem>>, vector<100x896xbf16>
    %104 = arith.mulf %102, %103 : vector<100x896xbf16>
    %c0_42 = arith.constant 0 : index
    %c0_43 = arith.constant 0 : index
    %105 = vector.load %arg5[%c0_42, %c0_43] : memref<896x32xbf16, #tpu.memory_space<vmem>>, vector<896x32xbf16>
    %cst_44 = arith.constant dense<0.000000e+00> : vector<100x32xf32>
    %106 = tpu.matmul %104, %105, %cst_44 {dimension_numbers = #tpu.dot_dimension_numbers<[1], [0], [0], [1], [0, 0, 1, 1], [], []>} : vector<100x896xbf16>, vector<896x32xbf16>, vector<100x32xf32> -> vector<100x32xf32>
    %c0_45 = arith.constant 0 : index
    %c0_46 = arith.constant 0 : index
    %107 = vector.load %arg6[%c0_45, %c0_46] : memref<4x100xbf16, #tpu.memory_space<vmem>>, vector<4x100xbf16>
    %108 = arith.truncf %106 : vector<100x32xf32> to vector<100x32xbf16>
    %cst_47 = arith.constant dense<0.000000e+00> : vector<4x32xf32>
    %109 = tpu.matmul %107, %108, %cst_47 {dimension_numbers = #tpu.dot_dimension_numbers<[1], [0], [0], [1], [0, 0, 1, 1], [], []>} : vector<4x100xbf16>, vector<100x32xbf16>, vector<4x32xf32> -> vector<4x32xf32>
    %c6 = arith.constant 6 : index
    %c0_48 = arith.constant 0 : index
    %110 = vector.load %arg3[%c6, %c0_48] : memref<8x128xf32, #tpu.memory_space<vmem>>, vector<1x32xf32>
    %c7 = arith.constant 7 : index
    %c0_49 = arith.constant 0 : index
    %111 = vector.load %arg3[%c7, %c0_49] : memref<8x128xf32, #tpu.memory_space<vmem>>, vector<1x32xf32>
    %cst_50 = arith.constant dense<0.000000e+00> : vector<32xf32>
    %112 = vector.multi_reduction <add>, %109, %cst_50 [0] : vector<4x32xf32> to vector<32xf32>
    %113 = vector.shape_cast %112 : vector<32xf32> to vector<1x32xf32>
    %cst_51 = arith.constant 2.500000e-01 : f32
    %114 = vector.broadcast %cst_51 : f32 to vector<1x32xf32>
    %115 = arith.mulf %113, %114 : vector<1x32xf32>
    %116 = arith.mulf %109, %109 : vector<4x32xf32>
    %cst_52 = arith.constant dense<0.000000e+00> : vector<32xf32>
    %117 = vector.multi_reduction <add>, %116, %cst_52 [0] : vector<4x32xf32> to vector<32xf32>
    %118 = vector.shape_cast %117 : vector<32xf32> to vector<1x32xf32>
    %cst_53 = arith.constant 2.500000e-01 : f32
    %119 = vector.broadcast %cst_53 : f32 to vector<1x32xf32>
    %120 = arith.mulf %118, %119 : vector<1x32xf32>
    %121 = arith.mulf %115, %115 : vector<1x32xf32>
    %122 = arith.subf %120, %121 : vector<1x32xf32>
    %cst_54 = arith.constant 0.000000e+00 : f32
    %123 = vector.broadcast %cst_54 : f32 to vector<1x32xf32>
    %124 = arith.maximumf %122, %123 : vector<1x32xf32>
    %125 = vector.broadcast %115 : vector<1x32xf32> to vector<4x32xf32>
    %126 = arith.subf %109, %125 : vector<4x32xf32>
    %cst_55 = arith.constant 9.99999974E-6 : f32
    %127 = vector.broadcast %cst_55 : f32 to vector<1x32xf32>
    %128 = arith.addf %124, %127 : vector<1x32xf32>
    %129 = math.rsqrt %128 : vector<1x32xf32>
    %130 = vector.broadcast %129 : vector<1x32xf32> to vector<4x32xf32>
    %131 = arith.mulf %126, %130 : vector<4x32xf32>
    %132 = vector.broadcast %110 : vector<1x32xf32> to vector<4x32xf32>
    %133 = arith.mulf %131, %132 : vector<4x32xf32>
    %134 = vector.broadcast %111 : vector<1x32xf32> to vector<4x32xf32>
    %135 = arith.addf %133, %134 : vector<4x32xf32>
    %cst_56 = arith.constant 0.000000e+00 : f32
    %136 = vector.broadcast %cst_56 : f32 to vector<4x32xf32>
    %137 = arith.maximumf %135, %136 : vector<4x32xf32>
    %c0_57 = arith.constant 0 : index
    %c0_58 = arith.constant 0 : index
    %138 = vector.load %arg7[%c0_57, %c0_58] : memref<4x32xf32, #tpu.memory_space<vmem>>, vector<4x32xf32>
    tpu.vector_store %arg7[%c0_57, %c0_58], %137 {strides = array<i32>} : memref<4x32xf32, #tpu.memory_space<vmem>>, vector<4x32xf32>,
    return
  }
}

</mosaic_0001>

<bundles_post_ra>
// kernel: latent_mlp_concat_forward.1
= control target key start
LH: loop header
LB: loop body
LE: loop exit
PB: predicated region body
PF: predicated region fallthrough
CT: control target
= control target key end

     0   :  { %12 = vsyncpa [#allocation3], 0  ;;  %s5298_s0 = inlined_call_operand.vmem [shape: bf16[100,128], index: 0, kind: input, shape index: {}]   ;;  %s5299_s1 = inlined_call_operand.vmem [shape: bf16[3,128,128], index: 1, kind: input, shape index: {}]   ;;  %s5300_s2 = inlined_call_operand.vmem [shape: bf16[128,896], index: 2, kind: input, shape index: {}]   ;;  %s5301_s3 = inlined_call_operand.vmem [shape: f32[8,128], index: 3, kind: input, shape index: {}]   ;;  %s5302_s4 = inlined_call_operand.hbm [shape: bf16[100,896], index: 4, kind: input, shape index: {}]   ;;  %s5303_s5 = inlined_call_operand.vmem [shape: bf16[896,32], index: 5, kind: input, shape index: {}]   ;;  %s5304_s6 = inlined_call_operand.vmem [shape: bf16[4,100], index: 6, kind: input, shape index: {}]   ;;  %s5305_s7 = inlined_call_operand.hbm [shape: f32[4,32], index: 7, kind: output, shape index: {}]  }
   0x1   :  { %13 = vsyncpa [#allocation4], 0  ;;  %s4146_s24 = smov [#allocation2]   ;;  %s4098_s28 = scalar_lea.hbm %s5302_s4, 5824 }
   0x2   :  { %s27_s25 = sshll.u32 %s4146_s24, 4  ;;  %p4099_p0 = scmp.ne.s32.totalorder %s5302_s4, %s4098_s28  ;;  %s28_s25 = int_to_ptr.vmem [resolvable:$true] %s27_s25 }
   0x3   :  { %p4102_p1 = scmp.lt.u32.totalorder %s4098_s28, %s5302_s4 }
   0x5   :  { %p4104_p2 = pnand %p4102_p1, %p4099_p0 }
   0x7   :  { %4107 = shalt.err (!%p4104_p2)
}
   0x8   :  { %s4108_s10 = scalar_lea.vmem %s28_s25, 5824  ;;  %p4113_p4 = scmp.lt.s32.totalorder %s28_s25, %s28_s25 }
   0x9   :  { %p4109_p3 = scmp.ne.s32.totalorder %s28_s25, %s4108_s10  ;;  %p4114_p5 = scmp.lt.s32.totalorder %s4108_s10, %s4108_s10 }
   0xb   :  { %p4115_p6 = por %p4114_p5, %p4113_p4 }
   0xd   :  { %p4116_p7 = pnand %p4115_p6, %p4109_p3 }
   0xf   :  { %4119 = shalt.err (!%p4116_p7)
}
  0x10   :  { %s4147_s11 = smov 448   ;;  %s4148_s12 = smov 28  }
  0x11   :  { %33 = dma.hbm_to_vmem [thread:$0]  %s5302_s4, 5824, %s28_s25, [#allocation3], %s4147_s11, %s4147_s11, %s4148_s12  }
  0x12   :  { %4142 = dma.done.wait [#allocation3], 5824  }
  0x13   :  { %4143 = vsyncadd [#allocation3], 4294961472  ;;  %v4149_v0 = vmov 0.0   ;;  %vm4150_vm0 = vmmov 0   ;;  %v3856_v1 = vld [vmem:[%s5299_s1] sm:$0xff]   ;;  %v3857_v2 = vld [vmem:[%s5299_s1 + $0x8] sm:$0xff]  }
  0x14   :  { %3610 = vmatprep.subr.bf16.mxu0 %v4149_v0  ;;  %3626 = vmatprep.mubr.msk.bf16.mxu0 %vm4150_vm0, %v4149_v0  ;;  %v3858_v3 = vld [vmem:[%s5299_s1 + $0x10] sm:$0xff]   ;;  %v3859_v4 = vld [vmem:[%s5299_s1 + $0x18] sm:$0xff]   ;;  %v3860_v5 = vld [vmem:[%s5299_s1 + $0x20] sm:$0xff]   ;;  %v4151_v16 = vmov 0   ;;  %vm281_vm1 = vcmask 1041408   ;;  %vm277_vm2 = vcmask 818176  }
  0x15   :  { %3611 = vmatpush3.bf16.msra.mxu0 %v3856_v1  ;;  %v3861_v6 = vld [vmem:[%s5299_s1 + $0x28] sm:$0xff]   ;;  %v3862_v7 = vld [vmem:[%s5299_s1 + $0x30] sm:$0xff]   ;;  %v3863_v8 = vld [vmem:[%s5299_s1 + $0x38] sm:$0xff]   ;;  %320 = vmatprep.mubr.bf16.mxu1 %v4151_v16  ;;  %vm3062_vm3 = vcmask 257024   ;;  %s4153_s27 = smov [#allocation5]  }
  0x16   :  { %3612 = vmatprep.subr.bf16.mxu0 %v4149_v0  ;;  %v3864_v9 = vld [vmem:[%s5298_s0] sm:$0xff]   ;;  %v3865_v10 = vld [vmem:[%s5298_s0 + $0x8] sm:$0xff]   ;;  %v3866_v11 = vld [vmem:[%s5298_s0 + $0x10] sm:$0xff]   ;;  %s3105_s28 = sshll.u32 %s4153_s27, 4  ;;  %s3106_s28 = int_to_ptr.vmem [resolvable:$true] %s3105_s28 }
  0x17   :  { %v3867_v12 = vld [vmem:[%s5298_s0 + $0x18] sm:$0xff]   ;;  %v3868_v13 = vld [vmem:[%s5298_s0 + $0x20] sm:$0xff]   ;;  %v3869_v14 = vld [vmem:[%s5298_s0 + $0x28] sm:$0xff]   ;;  %s4120_s29 = scalar_lea.vmem %s3106_s28, 64  ;;  %p4125_p9 = scmp.lt.s32.totalorder %s3106_s28, %s3106_s28 }
  0x18   :  { %v3870_v15 = vld [vmem:[%s5298_s0 + $0x30] ss:$0 sps:$4 sm:$0x33]   ;;  %p4121_p8 = scmp.ne.s32.totalorder %s3106_s28, %s4120_s29  ;;  %p4126_p10 = scmp.lt.s32.totalorder %s4120_s29, %s4120_s29 }
  0x19   :  { %3613 = vmatpush3.bf16.msra.mxu0 %v3857_v2 }
  0x1a   :  { %3614 = vmatprep.subr.bf16.mxu0 %v4149_v0  ;;  %p4127_p11 = por %p4126_p10, %p4125_p9 }
  0x1c   :  { %p4128_p12 = pnand %p4127_p11, %p4121_p8 }
  0x1d   :  { %3615 = vmatpush3.bf16.msra.mxu0 %v3858_v3 }
  0x1e   :  { %3616 = vmatprep.subr.bf16.mxu0 %v4149_v0 }
  0x21   :  { %3617 = vmatpush3.bf16.msra.mxu0 %v3859_v4 }
  0x22   :  { %3618 = vmatprep.subr.bf16.mxu0 %v4149_v0 }
  0x25   :  { %3619 = vmatpush3.bf16.msra.mxu0 %v3860_v5 }
  0x26   :  { %3620 = vmatprep.subr.bf16.mxu0 %v4149_v0 }
  0x29   :  { %3621 = vmatpush3.bf16.msra.mxu0 %v3861_v6 }
  0x2a   :  { %3622 = vmatprep.subr.bf16.mxu0 %v4149_v0 }
  0x2d   :  { %3623 = vmatpush3.bf16.msra.mxu0 %v3862_v7 }
  0x2e   :  { %3624 = vmatprep.subr.bf16.mxu0 %v4149_v0 }
  0x31   :  { %3625 = vmatpush3.bf16.msra.mxu0 %v3863_v8 }
  0x34   :  { %3627 = vmatmul.mubr.bf16.vlgmr.msra.gmra.mrb[0].mxu0 %v3864_v9 }
  0x35   :  { %3630 = vmatprep.mubr.msk.bf16.mxu0 %vm4150_vm0, %v4149_v0 }
  0x3c   :  { %3631 = vmatmul.mubr.bf16.gmra.mrb[4].mxu0 %v3865_v10  ;;  %v4152_v10 = vmov 1065369472  }
  0x3d   :  { %3634 = vmatprep.mubr.msk.bf16.mxu0 %vm4150_vm0, %v4149_v0 }
  0x44   :  { %3635 = vmatmul.mubr.bf16.gmra.mrb[8].mxu0 %v3866_v11  ;;  %v3871_v11 = vld [vmem:[%s5299_s1 + $0x40] sm:$0xff]  }
  0x45   :  { %3638 = vmatprep.mubr.msk.bf16.mxu0 %vm4150_vm0, %v4149_v0 }
  0x4c   :  { %3639 = vmatmul.mubr.bf16.gmra.mrb[12].mxu0 %v3867_v12  ;;  %v3872_v12 = vld [vmem:[%s5299_s1 + $0x48] sm:$0xff]  }
  0x4d   :  { %3642 = vmatprep.mubr.msk.bf16.mxu0 %vm4150_vm0, %v4149_v0 }
  0x54   :  { %3643 = vmatmul.mubr.bf16.gmra.mrb[16].mxu0 %v3868_v13  ;;  %v3873_v13 = vld [vmem:[%s5299_s1 + $0x50] sm:$0xff]  }
  0x55   :  { %3646 = vmatprep.mubr.msk.bf16.mxu0 %vm4150_vm0, %v4149_v0 }
  0x5c   :  { %3647 = vmatmul.mubr.bf16.gmra.mrb[20].mxu0 %v3869_v14  ;;  %v3874_v14 = vld [vmem:[%s5299_s1 + $0x58] sm:$0xff]  }
  0x5d   :  { %3650 = vmatprep.mubr.msk.bf16.mxu0 %vm4150_vm0, %v4149_v0 }
  0x64   :  { %3651 = vmatmul.mubr.bf16.gmra.mrb[24].mxu0 %v3870_v15  ;;  %v3875_v15 = vld [vmem:[%s5299_s1 + $0x60] sm:$0xff]  }
  0x65   :  { %644 = vmatprep.mubr.bf16.mxu0 %v4151_v16 }
 0x107   :  { %v4275_v17 = vpop.f32.mrb[0].mxu0 }
 0x108   :  { %v3628_v18 = vpop.f32.mrb[1].mxu0  ;;  %v257_v21 = vmul.f32 %v4275_v17, %v4275_v17 }
 0x109   :  { %v4277_v19 = vpop.f32.mrb[2].mxu0  ;;  %v3876_v18 = vld [vmem:[%s5299_s1 + $0x68] sm:$0xff]  }
 0x10a   :  { %v3629_v20 = vpop.f32.mrb[3].mxu0  ;;  %v258_v22 = vmul.f32 %v4277_v19, %v4277_v19  ;;  %v250_v23 = vpack.c.bf16 %v4277_v19, %v4275_v17 }
 0x10b   :  { %v3877_v20 = vld [vmem:[%s5299_s1 + $0x70] sm:$0xff]  }
 0x10c   :  { %v270_v24 = vpack.c.bf16 %v258_v22, %v257_v21  ;;  %v3878_v21 = vld [vmem:[%s5299_s1 + $0x78] sm:$0xff]   ;;  %v334_v22 = vlaneseq }
 0x10e   :  { %288 = vmatprep.subr.bf16.mxu1 %v270_v24 }
 0x10f   :  { %v4285_v25 = vpop.f32.mrb[4].mxu0  ;;  %289 = vmatpush1.bf16.msra.mxu1 %v250_v23  ;;  %v335_v23 = vshrl.u32 %v334_v22, 7 }
 0x110   :  { %v3632_v26 = vpop.f32.mrb[5].mxu0  ;;  %v259_v28 = vmul.f32 %v4285_v25, %v4285_v25 }
 0x111   :  { %v4287_v27 = vpop.f32.mrb[6].mxu0  ;;  %v4380_v24 = vsub.s32 0, %v335_v23 }
 0x112   :  { %v251_v29 = vpack.c.bf16 %v4287_v27, %v4285_v25  ;;  %v260_v30 = vmul.f32 %v4287_v27, %v4287_v27  ;;  %v3633_v31 = vpop.f32.mrb[7].mxu0 }
 0x114   :  { %v271_v32 = vpack.c.bf16 %v260_v30, %v259_v28 }
 0x116   :  { %290 = vmatprep.subr.bf16.mxu1 %v271_v32 }
 0x117   :  { %v4295_v33 = vpop.f32.mrb[8].mxu0  ;;  %291 = vmatpush1.bf16.msra.mxu1 %v251_v29 }
 0x118   :  { %v3636_v34 = vpop.f32.mrb[9].mxu0  ;;  %v261_v36 = vmul.f32 %v4295_v33, %v4295_v33 }
 0x119   :  { %v4297_v35 = vpop.f32.mrb[10].mxu0 }
 0x11a   :  { %v252_v37 = vpack.c.bf16 %v4297_v35, %v4295_v33  ;;  %v262_v38 = vmul.f32 %v4297_v35, %v4297_v35  ;;  %v3637_v39 = vpop.f32.mrb[11].mxu0 }
 0x11c   :  { %v272_v40 = vpack.c.bf16 %v262_v38, %v261_v36 }
 0x11e   :  { %292 = vmatprep.subr.bf16.mxu1 %v272_v40 }
 0x11f   :  { %v4305_v41 = vpop.f32.mrb[12].mxu0  ;;  %293 = vmatpush1.bf16.msra.mxu1 %v252_v37 }
 0x120   :  { %v3640_v42 = vpop.f32.mrb[13].mxu0  ;;  %v263_v44 = vmul.f32 %v4305_v41, %v4305_v41 }
 0x121   :  { %v4307_v43 = vpop.f32.mrb[14].mxu0 }
 0x122   :  { %v253_v45 = vpack.c.bf16 %v4307_v43, %v4305_v41  ;;  %v264_v46 = vmul.f32 %v4307_v43, %v4307_v43  ;;  %v3641_v47 = vpop.f32.mrb[15].mxu0 }
 0x124   :  { %v273_v48 = vpack.c.bf16 %v264_v46, %v263_v44 }
 0x126   :  { %294 = vmatprep.subr.bf16.mxu1 %v273_v48 }
 0x127   :  { %v4315_v49 = vpop.f32.mrb[16].mxu0  ;;  %295 = vmatpush1.bf16.msra.mxu1 %v253_v45 }
 0x128   :  { %v3644_v50 = vpop.f32.mrb[17].mxu0  ;;  %v265_v52 = vmul.f32 %v4315_v49, %v4315_v49 }
 0x129   :  { %v4317_v51 = vpop.f32.mrb[18].mxu0 }
 0x12a   :  { %v254_v53 = vpack.c.bf16 %v4317_v51, %v4315_v49  ;;  %v266_v54 = vmul.f32 %v4317_v51, %v4317_v51  ;;  %v3645_v55 = vpop.f32.mrb[19].mxu0 }
 0x12c   :  { %v274_v56 = vpack.c.bf16 %v266_v54, %v265_v52  ;;  %v4420_v54 = vld [vmem:[%s5301_s3 + $0x1] ss:$0 sm:$0xff] }
 0x12e   :  { %296 = vmatprep.subr.bf16.mxu1 %v274_v56 }
 0x12f   :  { %v4325_v57 = vpop.f32.mrb[20].mxu0  ;;  %297 = vmatpush1.bf16.msra.mxu1 %v254_v53 }
 0x130   :  { %v3648_v58 = vpop.f32.mrb[21].mxu0  ;;  %v267_v60 = vmul.f32 %v4325_v57, %v4325_v57 }
 0x131   :  { %v4327_v59 = vpop.f32.mrb[22].mxu0 }
 0x132   :  { %v255_v61 = vpack.c.bf16 %v4327_v59, %v4325_v57  ;;  %v268_v62 = vmul.f32 %v4327_v59, %v4327_v59  ;;  %v3649_v63 = vpop.f32.mrb[23].mxu0 }
 0x134   :  { %v275_v1 = vpack.c.bf16 %v268_v62, %v267_v60 }
 0x136   :  { %298 = vmatprep.subr.bf16.mxu1 %v275_v1 }
 0x137   :  { %v4335_v2 = vpop.f32.mrb[24].mxu0  ;;  %299 = vmatpush1.bf16.msra.mxu1 %v255_v61 }
 0x138   :  { %v256_v3 = vpack.c.bf16 %v4335_v2, %v4335_v2  ;;  %v269_v4 = vmul.f32 %v4335_v2, %v4335_v2  ;;  %v3652_v5 = vpop.f32.mrb[25].mxu0 }
 0x139   :  { %v245_v6 = vpop.f32.mrb[26].mxu0 }
 0x13a   :  { %v276_v7 = vpack.c.bf16 %v269_v4, %v269_v4  ;;  %v3653_v8 = vpop.f32.mrb[27].mxu0  ;;  %v283_v9 = vsel %vm281_vm1, %v256_v3, 0 }
 0x13c   :  { %3129 = vmatprep.subr.msk.bf16.mxu1 %vm281_vm1, %v276_v7 }
 0x13d   :  { %301 = vmatpush1.bf16.msra.mxu1 %v283_v9 }
 0x13e   :  { %3654 = vmatprep.subr.bf16.mxu1 %v4149_v0 }
 0x140   :  { %3130 = vmatmul.mubr.msk.bf16.vlgmr.msra.gmra.mrb[0].mxu1 %vm277_vm2, %v4152_v10 }
 0x141   :  { %3670 = vmatprep.mubr.msk.bf16.mxu1 %vm4150_vm0, %v4149_v0  ;;  %3655 = vmatpush3.bf16.msra.mxu1 %v3871_v11 }
 0x142   :  { %3656 = vmatprep.subr.bf16.mxu1 %v4149_v0 }
 0x145   :  { %3657 = vmatpush3.bf16.msra.mxu1 %v3872_v12 }
 0x146   :  { %3658 = vmatprep.subr.bf16.mxu1 %v4149_v0 }
 0x149   :  { %3659 = vmatpush3.bf16.msra.mxu1 %v3873_v13 }
 0x14a   :  { %3660 = vmatprep.subr.bf16.mxu1 %v4149_v0 }
 0x14d   :  { %3661 = vmatpush3.bf16.msra.mxu1 %v3874_v14 }
 0x14e   :  { %3662 = vmatprep.subr.bf16.mxu1 %v4149_v0 }
 0x151   :  { %3663 = vmatpush3.bf16.msra.mxu1 %v3875_v15 }
 0x152   :  { %3664 = vmatprep.subr.bf16.mxu1 %v4149_v0 }
 0x155   :  { %3665 = vmatpush3.bf16.msra.mxu1 %v3876_v18 }
 0x156   :  { %3666 = vmatprep.subr.bf16.mxu1 %v4149_v0 }
 0x159   :  { %3667 = vmatpush3.bf16.msra.mxu1 %v3877_v20 }
 0x15a   :  { %3668 = vmatprep.subr.bf16.mxu1 %v4149_v0 }
 0x15d   :  { %3669 = vmatpush3.bf16.msra.mxu1 %v3878_v21 }
 0x15e   :  { %3698 = vmatprep.subr.bf16.mxu1 %v4149_v0 }
 0x213   :  { %v322_v26 = vpop.f32.mrb[0].mxu1 }
 0x214   :  { %v329_v28 = vmul.f32 0.01, %v322_v26  ;;  %v324_v29 = vpop.f32.mrb[1].mxu1 }
 0x215   :  { %v330_v30 = vmul.f32 0.01, %v324_v29  ;;  %v326_v31 = vpop.f32.mrb[2].mxu1 }
 0x216   :  { %v331_v32 = vmul.f32 %v329_v28, %v329_v28  ;;  %v4383_v34 = vrot.slane %v329_v28, %v4380_v24  ;;  %v327_v36 = vpop.f32.mrb[3].mxu1 }
 0x218   :  { %v332_v37 = vsub.f32 %v330_v30, %v331_v32  ;;  %v338_v38 = vsub.f32 %v4275_v17, %v4383_v34  ;;  %v339_v39 = vsub.f32 %v4277_v19, %v4383_v34  ;;  %v340_v40 = vsub.f32 %v4285_v25, %v4383_v34 }
 0x219   :  { %v341_v42 = vsub.f32 %v4287_v27, %v4383_v34  ;;  %v342_v44 = vsub.f32 %v4295_v33, %v4383_v34  ;;  %v343_v45 = vsub.f32 %v4297_v35, %v4383_v34  ;;  %v344_v46 = vsub.f32 %v4305_v41, %v4383_v34 }
 0x21a   :  { %v333_v47 = vmax.f32 %v332_v37, 0.0  ;;  %v345_v17 = vsub.f32 %v4307_v43, %v4383_v34  ;;  %v346_v19 = vsub.f32 %v4315_v49, %v4383_v34  ;;  %v347_v25 = vsub.f32 %v4317_v51, %v4383_v34  ;;  %v4415_v49 = vld [vmem:[%s5301_s3] ss:$0 sm:$0xff] }
 0x21b   :  { %v348_v27 = vsub.f32 %v4325_v57, %v4383_v34  ;;  %v349_v33 = vsub.f32 %v4327_v59, %v4383_v34  ;;  %v350_v35 = vsub.f32 %v4335_v2, %v4383_v34 }
 0x21c   :  { %v351_v41 = vadd.f32 1e-05, %v333_v47 }
 0x21e   :  { %4090 = vrsqrt.f32 %v351_v41 }
 0x228   :  { %v4091_v48 = vpop.eup %4090 }
 0x229   :  { %v356_v43 = vrot.slane %v4091_v48, %v4380_v24 }
 0x22b   :  { %v357_v50 = vmul.f32 %v356_v43, %v338_v38  ;;  %v358_v51 = vmul.f32 %v356_v43, %v339_v39  ;;  %v359_v52 = vmul.f32 %v356_v43, %v340_v40  ;;  %v360_v53 = vmul.f32 %v356_v43, %v341_v42 }
 0x22c   :  { %v361_v55 = vmul.f32 %v356_v43, %v342_v44  ;;  %v362_v56 = vmul.f32 %v356_v43, %v343_v45  ;;  %v363_v57 = vmul.f32 %v356_v43, %v344_v46  ;;  %v364_v58 = vmul.f32 %v356_v43, %v345_v17 }
 0x22d   :  { %v374_v59 = vmul.f32 %v4415_v49, %v357_v50  ;;  %v375_v60 = vmul.f32 %v4415_v49, %v358_v51  ;;  %v376_v61 = vmul.f32 %v4415_v49, %v359_v52  ;;  %v377_v62 = vmul.f32 %v4415_v49, %v360_v53  ;;  %v3879_v51 = vld [vmem:[%s5299_s1 + $0x80] sm:$0xff]   ;;  %v3881_v52 = vld [vmem:[%s5299_s1 + $0x90] sm:$0xff]  }
 0x22e   :  { %v378_v63 = vmul.f32 %v4415_v49, %v361_v55  ;;  %v379_v1 = vmul.f32 %v4415_v49, %v362_v56  ;;  %v380_v2 = vmul.f32 %v4415_v49, %v363_v57  ;;  %v381_v3 = vmul.f32 %v4415_v49, %v364_v58 }
 0x22f   :  { %v391_v4 = vadd.f32 %v4420_v54, %v374_v59  ;;  %v392_v5 = vadd.f32 %v4420_v54, %v375_v60  ;;  %v393_v6 = vadd.f32 %v4420_v54, %v376_v61  ;;  %v394_v7 = vadd.f32 %v4420_v54, %v377_v62 }
 0x230   :  { %v395_v8 = vadd.f32 %v4420_v54, %v378_v63  ;;  %v396_v9 = vadd.f32 %v4420_v54, %v379_v1  ;;  %v397_v11 = vadd.f32 %v4420_v54, %v380_v2  ;;  %v398_v12 = vadd.f32 %v4420_v54, %v381_v3 }
 0x231   :  { %v404_v13 = vmax.f32 %v391_v4, 0.0  ;;  %v405_v14 = vmax.f32 %v392_v5, 0.0  ;;  %v406_v15 = vmax.f32 %v393_v6, 0.0  ;;  %v407_v18 = vmax.f32 %v394_v7, 0.0 }
 0x232   :  { %v408_v20 = vmax.f32 %v395_v8, 0.0  ;;  %v409_v21 = vmax.f32 %v396_v9, 0.0  ;;  %v410_v22 = vmax.f32 %v397_v11, 0.0  ;;  %v411_v23 = vmax.f32 %v398_v12, 0.0 }
 0x233   :  { %v417_v26 = vpack.c.bf16 %v405_v14, %v404_v13  ;;  %v418_v28 = vpack.c.bf16 %v407_v18, %v406_v15  ;;  %v365_v29 = vmul.f32 %v356_v43, %v346_v19  ;;  %v366_v30 = vmul.f32 %v356_v43, %v347_v25 }
 0x234   :  { %v419_v31 = vpack.c.bf16 %v409_v21, %v408_v20  ;;  %v420_v32 = vpack.c.bf16 %v411_v23, %v410_v22  ;;  %v367_v34 = vmul.f32 %v356_v43, %v348_v27  ;;  %v368_v36 = vmul.f32 %v356_v43, %v349_v33 }
 0x235   :  { %3671 = vmatmul.mubr.bf16.vlgmr.msra.gmra.mrb[4].mxu1 %v417_v26  ;;  %v382_v37 = vmul.f32 %v4415_v49, %v365_v29  ;;  %v383_v38 = vmul.f32 %v4415_v49, %v366_v30  ;;  %v369_v39 = vmul.f32 %v356_v43, %v350_v35 }
 0x236   :  { %3674 = vmatprep.mubr.msk.bf16.mxu1 %vm4150_vm0, %v4149_v0  ;;  %v384_v40 = vmul.f32 %v4415_v49, %v367_v34  ;;  %v385_v42 = vmul.f32 %v4415_v49, %v368_v36  ;;  %3699 = vmatpush3.bf16.msra.mxu1 %v3879_v51  ;;  %v3883_v51 = vld [vmem:[%s5299_s1 + $0xa0] sm:$0xff]  }
 0x237   :  { %v399_v44 = vadd.f32 %v4420_v54, %v382_v37  ;;  %v400_v45 = vadd.f32 %v4420_v54, %v383_v38  ;;  %v386_v41 = vmul.f32 %v4415_v49, %v369_v39  ;;  %v3880_v49 = vld [vmem:[%s5299_s1 + $0x88] sm:$0xff]   ;;  %3700 = vmatprep.subr.bf16.mxu1 %v4149_v0 }
 0x238   :  { %v401_v46 = vadd.f32 %v4420_v54, %v384_v40  ;;  %v402_v47 = vadd.f32 %v4420_v54, %v385_v42 }
 0x239   :  { %v412_v17 = vmax.f32 %v399_v44, 0.0  ;;  %v413_v19 = vmax.f32 %v400_v45, 0.0  ;;  %v403_v48 = vadd.f32 %v4420_v54, %v386_v41 }
 0x23a   :  { %v414_v25 = vmax.f32 %v401_v46, 0.0  ;;  %v415_v27 = vmax.f32 %v402_v47, 0.0  ;;  %3701 = vmatpush3.bf16.msra.mxu1 %v3880_v49  ;;  %v3884_v49 = vld [vmem:[%s5299_s1 + $0xa8] sm:$0xff]  }
 0x23b   :  { %v421_v33 = vpack.c.bf16 %v413_v19, %v412_v17  ;;  %v416_v43 = vmax.f32 %v403_v48, 0.0  ;;  %3702 = vmatprep.subr.bf16.mxu1 %v4149_v0 }
 0x23c   :  { %v422_v35 = vpack.c.bf16 %v415_v27, %v414_v25 }
 0x23d   :  { %3675 = vmatmul.mubr.bf16.gmra.mrb[8].mxu1 %v418_v28  ;;  %v423_v50 = vpack.c.bf16 %v416_v43, %v416_v43 }
 0x23e   :  { %3678 = vmatprep.mubr.msk.bf16.mxu1 %vm4150_vm0, %v4149_v0  ;;  %3703 = vmatpush3.bf16.msra.mxu1 %v3881_v52  ;;  %v3885_v52 = vld [vmem:[%s5299_s1 + $0xb0] sm:$0xff]  }
 0x23f   :  { %3704 = vmatprep.subr.bf16.mxu1 %v4149_v0 }
 0x245   :  { %3679 = vmatmul.mubr.bf16.gmra.mrb[12].mxu1 %v419_v31 }
 0x246   :  { %3682 = vmatprep.mubr.msk.bf16.mxu1 %vm4150_vm0, %v4149_v0 }
 0x24d   :  { %3683 = vmatmul.mubr.bf16.gmra.mrb[16].mxu1 %v420_v32 }
 0x24e   :  { %3686 = vmatprep.mubr.msk.bf16.mxu1 %vm4150_vm0, %v4149_v0 }
 0x255   :  { %3687 = vmatmul.mubr.bf16.gmra.mrb[20].mxu1 %v421_v33 }
 0x256   :  { %3690 = vmatprep.mubr.msk.bf16.mxu1 %vm4150_vm0, %v4149_v0 }
 0x25d   :  { %3691 = vmatmul.mubr.bf16.gmra.mrb[24].mxu1 %v422_v35 }
 0x25e   :  { %3694 = vmatprep.mubr.msk.bf16.mxu1 %vm4150_vm0, %v4149_v0 }
 0x265   :  { %3695 = vmatmul.mubr.bf16.gmra.mrb[28].mxu1 %v423_v50  ;;  %v3882_v50 = vld [vmem:[%s5299_s1 + $0x98] sm:$0xff]  }
 0x266   :  { %3714 = vmatprep.mubr.msk.bf16.mxu1 %vm4150_vm0, %v4149_v0  ;;  %3705 = vmatpush3.bf16.msra.mxu1 %v3882_v50 }
 0x267   :  { %3706 = vmatprep.subr.bf16.mxu1 %v4149_v0 }
 0x26a   :  { %3707 = vmatpush3.bf16.msra.mxu1 %v3883_v51 }
 0x26b   :  { %3708 = vmatprep.subr.bf16.mxu1 %v4149_v0 }
 0x26e   :  { %3709 = vmatpush3.bf16.msra.mxu1 %v3884_v49 }
 0x26f   :  { %3710 = vmatprep.subr.bf16.mxu1 %v4149_v0 }
 0x272   :  { %3711 = vmatpush3.bf16.msra.mxu1 %v3885_v52 }
 0x273   :  { %3712 = vmatprep.subr.bf16.mxu1 %v4149_v0 }
 0x308   :  { %v4474_v53 = vpop.f32.mrb[4].mxu1 }
 0x309   :  { %v3672_v54 = vpop.f32.mrb[5].mxu1  ;;  %v586_v56 = vmul.f32 %v4474_v53, %v4474_v53 }
 0x30a   :  { %v4476_v55 = vpop.f32.mrb[6].mxu1  ;;  %v3886_v54 = vld [vmem:[%s5299_s1 + $0xb8] sm:$0xff]  }
 0x30b   :  { %v579_v57 = vpack.c.bf16 %v4476_v55, %v4474_v53  ;;  %v587_v58 = vmul.f32 %v4476_v55, %v4476_v55  ;;  %v3673_v59 = vpop.f32.mrb[7].mxu1  ;;  %3713 = vmatpush3.bf16.msra.mxu1 %v3886_v54 }
 0x30d   :  { %v599_v60 = vpack.c.bf16 %v587_v58, %v586_v56 }
 0x30f   :  { %612 = vmatprep.subr.bf16.mxu0 %v599_v60 }
 0x310   :  { %v4484_v61 = vpop.f32.mrb[8].mxu1  ;;  %613 = vmatpush1.bf16.msra.mxu0 %v579_v57 }
 0x311   :  { %v3676_v62 = vpop.f32.mrb[9].mxu1  ;;  %v588_v1 = vmul.f32 %v4484_v61, %v4484_v61 }
 0x312   :  { %v4486_v63 = vpop.f32.mrb[10].mxu1 }
 0x313   :  { %v580_v2 = vpack.c.bf16 %v4486_v63, %v4484_v61  ;;  %v589_v3 = vmul.f32 %v4486_v63, %v4486_v63  ;;  %v3677_v4 = vpop.f32.mrb[11].mxu1 }
 0x315   :  { %v600_v5 = vpack.c.bf16 %v589_v3, %v588_v1 }
 0x317   :  { %614 = vmatprep.subr.bf16.mxu0 %v600_v5 }
 0x318   :  { %v4494_v6 = vpop.f32.mrb[12].mxu1  ;;  %615 = vmatpush1.bf16.msra.mxu0 %v580_v2 }
 0x319   :  { %v3680_v7 = vpop.f32.mrb[13].mxu1  ;;  %v590_v9 = vmul.f32 %v4494_v6, %v4494_v6 }
 0x31a   :  { %v4496_v8 = vpop.f32.mrb[14].mxu1 }
 0x31b   :  { %v581_v11 = vpack.c.bf16 %v4496_v8, %v4494_v6  ;;  %v591_v12 = vmul.f32 %v4496_v8, %v4496_v8  ;;  %v3681_v13 = vpop.f32.mrb[15].mxu1 }
 0x31d   :  { %v601_v14 = vpack.c.bf16 %v591_v12, %v590_v9 }
 0x31f   :  { %616 = vmatprep.subr.bf16.mxu0 %v601_v14 }
 0x320   :  { %v4504_v15 = vpop.f32.mrb[16].mxu1  ;;  %617 = vmatpush1.bf16.msra.mxu0 %v581_v11 }
 0x321   :  { %v3684_v18 = vpop.f32.mrb[17].mxu1  ;;  %v592_v21 = vmul.f32 %v4504_v15, %v4504_v15 }
 0x322   :  { %v4506_v20 = vpop.f32.mrb[18].mxu1 }
 0x323   :  { %v582_v22 = vpack.c.bf16 %v4506_v20, %v4504_v15  ;;  %v593_v23 = vmul.f32 %v4506_v20, %v4506_v20  ;;  %v3685_v26 = vpop.f32.mrb[19].mxu1 }
 0x325   :  { %v602_v28 = vpack.c.bf16 %v593_v23, %v592_v21  ;;  %v4597_v21 = vld [vmem:[%s5301_s3 + $0x2] ss:$0 sm:$0xff] }
 0x327   :  { %618 = vmatprep.subr.bf16.mxu0 %v602_v28 }
 0x328   :  { %v4514_v29 = vpop.f32.mrb[20].mxu1  ;;  %619 = vmatpush1.bf16.msra.mxu0 %v582_v22 }
 0x329   :  { %v3688_v30 = vpop.f32.mrb[21].mxu1  ;;  %v594_v32 = vmul.f32 %v4514_v29, %v4514_v29 }
 0x32a   :  { %v4516_v31 = vpop.f32.mrb[22].mxu1 }
 0x32b   :  { %v583_v34 = vpack.c.bf16 %v4516_v31, %v4514_v29  ;;  %v595_v36 = vmul.f32 %v4516_v31, %v4516_v31  ;;  %v3689_v37 = vpop.f32.mrb[23].mxu1 }
 0x32d   :  { %v603_v38 = vpack.c.bf16 %v595_v36, %v594_v32 }
 0x32f   :  { %620 = vmatprep.subr.bf16.mxu0 %v603_v38 }
 0x330   :  { %v4524_v39 = vpop.f32.mrb[24].mxu1  ;;  %621 = vmatpush1.bf16.msra.mxu0 %v583_v34 }
 0x331   :  { %v3692_v40 = vpop.f32.mrb[25].mxu1  ;;  %v596_v44 = vmul.f32 %v4524_v39, %v4524_v39 }
 0x332   :  { %v4526_v42 = vpop.f32.mrb[26].mxu1 }
 0x333   :  { %v584_v45 = vpack.c.bf16 %v4526_v42, %v4524_v39  ;;  %v597_v46 = vmul.f32 %v4526_v42, %v4526_v42  ;;  %v3693_v47 = vpop.f32.mrb[27].mxu1 }
 0x335   :  { %v604_v17 = vpack.c.bf16 %v597_v46, %v596_v44 }
 0x337   :  { %622 = vmatprep.subr.bf16.mxu0 %v604_v17 }
 0x338   :  { %v4534_v19 = vpop.f32.mrb[28].mxu1  ;;  %623 = vmatpush1.bf16.msra.mxu0 %v584_v45 }
 0x339   :  { %v585_v25 = vpack.c.bf16 %v4534_v19, %v4534_v19  ;;  %v598_v27 = vmul.f32 %v4534_v19, %v4534_v19  ;;  %v3696_v33 = vpop.f32.mrb[29].mxu1 }
 0x33a   :  { %v574_v35 = vpop.f32.mrb[30].mxu1 }
 0x33b   :  { %v605_v41 = vpack.c.bf16 %v598_v27, %v598_v27  ;;  %v3697_v48 = vpop.f32.mrb[31].mxu1  ;;  %v607_v43 = vsel %vm281_vm1, %v585_v25, 0 }
 0x33d   :  { %3157 = vmatprep.subr.msk.bf16.mxu0 %vm281_vm1, %v605_v41 }
 0x33e   :  { %625 = vmatpush1.bf16.msra.mxu0 %v607_v43 }
 0x341   :  { %3158 = vmatmul.mubr.msk.bf16.vlgmr.msra.gmra.mrb[28].mxu0 %vm277_vm2, %v4152_v10 }
 0x342   :  { %968 = vmatprep.mubr.bf16.mxu0 %v4151_v16 }
 0x414   :  { %v646_v56 = vpop.f32.mrb[28].mxu0 }
 0x415   :  { %v653_v57 = vmul.f32 0.01, %v646_v56  ;;  %v648_v58 = vpop.f32.mrb[29].mxu0 }
 0x416   :  { %v654_v59 = vmul.f32 0.01, %v648_v58  ;;  %v650_v60 = vpop.f32.mrb[30].mxu0 }
 0x417   :  { %v655_v62 = vmul.f32 %v653_v57, %v653_v57  ;;  %v4565_v1 = vrot.slane %v653_v57, %v4380_v24  ;;  %v651_v2 = vpop.f32.mrb[31].mxu0 }
 0x419   :  { %v656_v3 = vsub.f32 %v654_v59, %v655_v62  ;;  %v662_v4 = vsub.f32 %v4474_v53, %v4565_v1  ;;  %v663_v5 = vsub.f32 %v4476_v55, %v4565_v1  ;;  %v664_v7 = vsub.f32 %v4484_v61, %v4565_v1 }
 0x41a   :  { %v665_v9 = vsub.f32 %v4486_v63, %v4565_v1  ;;  %v666_v11 = vsub.f32 %v4494_v6, %v4565_v1  ;;  %v667_v12 = vsub.f32 %v4496_v8, %v4565_v1  ;;  %v668_v13 = vsub.f32 %v4504_v15, %v4565_v1 }
 0x41b   :  { %v657_v14 = vmax.f32 %v656_v3, 0.0  ;;  %v669_v53 = vsub.f32 %v4506_v20, %v4565_v1  ;;  %v670_v55 = vsub.f32 %v4514_v29, %v4565_v1  ;;  %v671_v61 = vsub.f32 %v4516_v31, %v4565_v1  ;;  %v4602_v29 = vld [vmem:[%s5301_s3 + $0x3] ss:$0 sm:$0xff] }
 0x41c   :  { %v672_v63 = vsub.f32 %v4524_v39, %v4565_v1  ;;  %v673_v6 = vsub.f32 %v4526_v42, %v4565_v1  ;;  %v674_v8 = vsub.f32 %v4534_v19, %v4565_v1 }
 0x41d   :  { %v675_v15 = vadd.f32 1e-05, %v657_v14 }
 0x41f   :  { %4092 = vrsqrt.f32 %v675_v15 }
 0x429   :  { %v4093_v18 = vpop.eup %4092 }
 0x42a   :  { %v680_v20 = vrot.slane %v4093_v18, %v4380_v24 }
 0x42c   :  { %v681_v22 = vmul.f32 %v680_v20, %v662_v4  ;;  %v682_v23 = vmul.f32 %v680_v20, %v663_v5  ;;  %v683_v26 = vmul.f32 %v680_v20, %v664_v7  ;;  %v684_v28 = vmul.f32 %v680_v20, %v665_v9 }
 0x42d   :  { %v685_v30 = vmul.f32 %v680_v20, %v666_v11  ;;  %v686_v31 = vmul.f32 %v680_v20, %v667_v12  ;;  %v687_v32 = vmul.f32 %v680_v20, %v668_v13  ;;  %v688_v34 = vmul.f32 %v680_v20, %v669_v53 }
 0x42e   :  { %v698_v36 = vmul.f32 %v4597_v21, %v681_v22  ;;  %v699_v37 = vmul.f32 %v4597_v21, %v682_v23  ;;  %v700_v38 = vmul.f32 %v4597_v21, %v683_v26  ;;  %v701_v39 = vmul.f32 %v4597_v21, %v684_v28  ;;  %v3887_v23 = vld [vmem:[%s5300_s2 + $0x8] ss:$28 sps:$4 sm:$0xff]   ;;  %v3890_v28 = vld [vmem:[%s5300_s2 + $0x40] ss:$28 sps:$4 sm:$0xff]  }
 0x42f   :  { %v702_v40 = vmul.f32 %v4597_v21, %v685_v30  ;;  %v703_v42 = vmul.f32 %v4597_v21, %v686_v31  ;;  %v704_v44 = vmul.f32 %v4597_v21, %v687_v32  ;;  %v705_v45 = vmul.f32 %v4597_v21, %v688_v34  ;;  %v3889_v26 = vld [vmem:[%s5300_s2 + $0xc] ss:$28 sps:$4 sm:$0xff]  }
 0x430   :  { %v715_v46 = vadd.f32 %v4602_v29, %v698_v36  ;;  %v716_v47 = vadd.f32 %v4602_v29, %v699_v37  ;;  %v717_v17 = vadd.f32 %v4602_v29, %v700_v38  ;;  %v718_v19 = vadd.f32 %v4602_v29, %v701_v39  ;;  %1525 = vmatprep.subr.bf16.mxu1 %v3889_v26  ;;  %v3893_v26 = vld [vmem:[%s5300_s2] ss:$28 sps:$4 sm:$0xff]  }
 0x431   :  { %v719_v25 = vadd.f32 %v4602_v29, %v702_v40  ;;  %v720_v27 = vadd.f32 %v4602_v29, %v703_v42  ;;  %v721_v33 = vadd.f32 %v4602_v29, %v704_v44  ;;  %v722_v35 = vadd.f32 %v4602_v29, %v705_v45 }
 0x432   :  { %v728_v41 = vmax.f32 %v715_v46, 0.0  ;;  %v729_v48 = vmax.f32 %v716_v47, 0.0  ;;  %v730_v43 = vmax.f32 %v717_v17, 0.0  ;;  %v731_v50 = vmax.f32 %v718_v19, 0.0 }
 0x433   :  { %v732_v51 = vmax.f32 %v719_v25, 0.0  ;;  %v733_v49 = vmax.f32 %v720_v27, 0.0  ;;  %v734_v52 = vmax.f32 %v721_v33, 0.0  ;;  %v735_v54 = vmax.f32 %v722_v35, 0.0 }
 0x434   :  { %v741_v56 = vpack.c.bf16 %v729_v48, %v728_v41  ;;  %v742_v57 = vpack.c.bf16 %v731_v50, %v730_v43  ;;  %v689_v58 = vmul.f32 %v680_v20, %v670_v55  ;;  %v690_v59 = vmul.f32 %v680_v20, %v671_v61 }
 0x435   :  { %v743_v60 = vpack.c.bf16 %v733_v49, %v732_v51  ;;  %v744_v62 = vpack.c.bf16 %v735_v54, %v734_v52  ;;  %v691_v1 = vmul.f32 %v680_v20, %v672_v63  ;;  %v692_v2 = vmul.f32 %v680_v20, %v673_v6 }
 0x436   :  { %3715 = vmatmul.mubr.bf16.vlgmr.msra.gmra.mrb[32].mxu1 %v741_v56  ;;  %v706_v3 = vmul.f32 %v4597_v21, %v689_v58  ;;  %v707_v4 = vmul.f32 %v4597_v21, %v690_v59  ;;  %v693_v5 = vmul.f32 %v680_v20, %v674_v8 }
 0x437   :  { %3718 = vmatprep.mubr.msk.bf16.mxu1 %vm4150_vm0, %v4149_v0  ;;  %v708_v7 = vmul.f32 %v4597_v21, %v691_v1  ;;  %v709_v9 = vmul.f32 %v4597_v21, %v692_v2  ;;  %1526 = vmatpush1.bf16.msra.mxu1 %v3887_v23  ;;  %v3895_v23 = vld [vmem:[%s5300_s2 + $0x4] ss:$28 sps:$4 sm:$0xff]  }
 0x438   :  { %v723_v11 = vadd.f32 %v4602_v29, %v706_v3  ;;  %v724_v12 = vadd.f32 %v4602_v29, %v707_v4  ;;  %v710_v15 = vmul.f32 %v4597_v21, %v693_v5  ;;  %v3892_v21 = vld [vmem:[%s5300_s2 + $0x44] ss:$28 sps:$4 sm:$0xff]  }
 0x439   :  { %v725_v13 = vadd.f32 %v4602_v29, %v708_v7  ;;  %v726_v14 = vadd.f32 %v4602_v29, %v709_v9  ;;  %1527 = vmatprep.subr.bf16.mxu1 %v3892_v21  ;;  %v3901_v21 = vld [vmem:[%s5300_s2 + $0x3c] ss:$28 sps:$4 sm:$0xff]  }
 0x43a   :  { %v736_v53 = vmax.f32 %v723_v11, 0.0  ;;  %v737_v55 = vmax.f32 %v724_v12, 0.0  ;;  %v727_v18 = vadd.f32 %v4602_v29, %v710_v15 }
 0x43b   :  { %v738_v61 = vmax.f32 %v725_v13, 0.0  ;;  %v739_v63 = vmax.f32 %v726_v14, 0.0  ;;  %1528 = vmatpush1.bf16.msra.mxu1 %v3890_v28  ;;  %v3898_v28 = vld [vmem:[%s5300_s2 + $0x7c] ss:$28 sps:$4 sm:$0xff]  }
 0x43c   :  { %v745_v6 = vpack.c.bf16 %v737_v55, %v736_v53  ;;  %v740_v20 = vmax.f32 %v727_v18, 0.0  ;;  %1529 = vmatprep.subr.bf16.mxu1 %v3898_v28 }
 0x43d   :  { %v746_v8 = vpack.c.bf16 %v739_v63, %v738_v61 }
 0x43e   :  { %3719 = vmatmul.mubr.bf16.gmra.mrb[36].mxu1 %v742_v57  ;;  %v747_v22 = vpack.c.bf16 %v740_v20, %v740_v20 }
 0x43f   :  { %3722 = vmatprep.mubr.msk.bf16.mxu1 %vm4150_vm0, %v4149_v0 }
 0x446   :  { %3723 = vmatmul.mubr.bf16.gmra.mrb[40].mxu1 %v743_v60 }
 0x447   :  { %3726 = vmatprep.mubr.msk.bf16.mxu1 %vm4150_vm0, %v4149_v0 }
 0x44e   :  { %3727 = vmatmul.mubr.bf16.gmra.mrb[44].mxu1 %v744_v62 }
 0x44f   :  { %3730 = vmatprep.mubr.msk.bf16.mxu1 %vm4150_vm0, %v4149_v0 }
 0x456   :  { %3731 = vmatmul.mubr.bf16.gmra.mrb[48].mxu1 %v745_v6 }
 0x457   :  { %3734 = vmatprep.mubr.msk.bf16.mxu1 %vm4150_vm0, %v4149_v0 }
 0x45e   :  { %3735 = vmatmul.mubr.bf16.gmra.mrb[52].mxu1 %v746_v8 }
 0x45f   :  { %3738 = vmatprep.mubr.msk.bf16.mxu1 %vm4150_vm0, %v4149_v0 }
 0x466   :  { %3739 = vmatmul.mubr.bf16.gmra.mrb[56].mxu1 %v747_v22 }
 0x467   :  { %1557 = vmatprep.mubr.bf16.mxu1 %v4151_v16 }
 0x509   :  { %v4655_v29 = vpop.f32.mrb[32].mxu1 }
 0x50a   :  { %v3716_v30 = vpop.f32.mrb[33].mxu1  ;;  %v910_v32 = vmul.f32 %v4655_v29, %v4655_v29 }
 0x50b   :  { %v4657_v31 = vpop.f32.mrb[34].mxu1  ;;  %v3904_v30 = vld [vmem:[%s5300_s2 + $0x74] ss:$28 sps:$4 sm:$0xff]  }
 0x50c   :  { %v903_v34 = vpack.c.bf16 %v4657_v31, %v4655_v29  ;;  %v911_v36 = vmul.f32 %v4657_v31, %v4657_v31  ;;  %v3717_v37 = vpop.f32.mrb[35].mxu1 }
 0x50d   :  { %v3907_v37 = vld [vmem:[%s5300_s2 + $0xb4] ss:$28 sps:$4 sm:$0xff]  }
 0x50e   :  { %v923_v38 = vpack.c.bf16 %v911_v36, %v910_v32  ;;  %v3896_v32 = vld [vmem:[%s5300_s2 + $0x78] ss:$28 sps:$4 sm:$0xff]   ;;  %v3905_v36 = vld [vmem:[%s5300_s2 + $0xb0] ss:$28 sps:$4 sm:$0xff]  }
 0x50f   :  { %1530 = vmatpush1.bf16.msra.mxu1 %v3896_v32 }
 0x510   :  { %936 = vmatprep.subr.bf16.mxu0 %v923_v38  ;;  %v3908_v38 = vld [vmem:[%s5300_s2 + $0xa8] ss:$28 sps:$4 sm:$0xff]   ;;  %1531 = vmatprep.subr.bf16.mxu1 %v3907_v37 }
 0x511   :  { %v4665_v39 = vpop.f32.mrb[36].mxu1  ;;  %937 = vmatpush1.bf16.msra.mxu0 %v903_v34  ;;  %v3902_v34 = vld [vmem:[%s5300_s2 + $0x70] ss:$28 sps:$4 sm:$0xff]  }
 0x512   :  { %v3720_v40 = vpop.f32.mrb[37].mxu1  ;;  %v912_v44 = vmul.f32 %v4665_v39, %v4665_v39 }
 0x513   :  { %v4667_v42 = vpop.f32.mrb[38].mxu1  ;;  %v3910_v40 = vld [vmem:[%s5300_s2 + $0xac] ss:$28 sps:$4 sm:$0xff]   ;;  %1532 = vmatpush1.bf16.msra.mxu1 %v3905_v36 }
 0x514   :  { %v904_v45 = vpack.c.bf16 %v4667_v42, %v4665_v39  ;;  %v913_v46 = vmul.f32 %v4667_v42, %v4667_v42  ;;  %v3721_v47 = vpop.f32.mrb[39].mxu1 }
 0x515   :  { %v3914_v47 = vld [vmem:[%s5300_s2 + $0xe0] ss:$28 sps:$4 sm:$0xff]  }
 0x516   :  { %v924_v17 = vpack.c.bf16 %v913_v46, %v912_v44  ;;  %v3913_v44 = vld [vmem:[%s5300_s2 + $0xec] ss:$28 sps:$4 sm:$0xff]  }
 0x517   :  { %v3911_v46 = vld [vmem:[%s5300_s2 + $0xe8] ss:$28 sps:$4 sm:$0xff]   ;;  %1533 = vmatprep.subr.bf16.mxu1 %v3913_v44 }
 0x518   :  { %938 = vmatprep.subr.bf16.mxu0 %v924_v17  ;;  %v3922_v17 = vld [vmem:[%s5300_s2 + $0x124] ss:$28 sps:$4 sm:$0xff]   ;;  %1534 = vmatpush1.bf16.msra.mxu1 %v3911_v46 }
 0x519   :  { %v4675_v19 = vpop.f32.mrb[40].mxu1  ;;  %939 = vmatpush1.bf16.msra.mxu0 %v904_v45  ;;  %v3916_v45 = vld [vmem:[%s5300_s2 + $0xe4] ss:$28 sps:$4 sm:$0xff]   ;;  %1535 = vmatprep.subr.bf16.mxu1 %v3922_v17 }
 0x51a   :  { %v3724_v25 = vpop.f32.mrb[41].mxu1  ;;  %v914_v33 = vmul.f32 %v4675_v19, %v4675_v19 }
 0x51b   :  { %v4677_v27 = vpop.f32.mrb[42].mxu1  ;;  %v3919_v25 = vld [vmem:[%s5300_s2 + $0x11c] ss:$28 sps:$4 sm:$0xff]  }
 0x51c   :  { %v905_v35 = vpack.c.bf16 %v4677_v27, %v4675_v19  ;;  %v915_v41 = vmul.f32 %v4677_v27, %v4677_v27  ;;  %v3725_v48 = vpop.f32.mrb[43].mxu1 }
 0x51d   :  { %v3925_v48 = vld [vmem:[%s5300_s2 + $0x154] ss:$28 sps:$4 sm:$0xff]  }
 0x51e   :  { %v925_v43 = vpack.c.bf16 %v915_v41, %v914_v33  ;;  %v3920_v33 = vld [vmem:[%s5300_s2 + $0x120] ss:$28 sps:$4 sm:$0xff]  }
 0x51f   :  { %v3928_v41 = vld [vmem:[%s5300_s2 + $0x15c] ss:$28 sps:$4 sm:$0xff]   ;;  %1536 = vmatpush1.bf16.msra.mxu1 %v3920_v33 }
 0x520   :  { %940 = vmatprep.subr.bf16.mxu0 %v925_v43  ;;  %v3926_v43 = vld [vmem:[%s5300_s2 + $0x158] ss:$28 sps:$4 sm:$0xff]   ;;  %1537 = vmatprep.subr.bf16.mxu1 %v3928_v41 }
 0x521   :  { %v4685_v50 = vpop.f32.mrb[44].mxu1  ;;  %941 = vmatpush1.bf16.msra.mxu0 %v905_v35  ;;  %v3917_v35 = vld [vmem:[%s5300_s2 + $0x118] ss:$28 sps:$4 sm:$0xff]  }
 0x522   :  { %v3728_v51 = vpop.f32.mrb[45].mxu1  ;;  %v916_v52 = vmul.f32 %v4685_v50, %v4685_v50 }
 0x523   :  { %v4687_v49 = vpop.f32.mrb[46].mxu1  ;;  %v3923_v51 = vld [vmem:[%s5300_s2 + $0x150] ss:$28 sps:$4 sm:$0xff]   ;;  %1538 = vmatpush1.bf16.msra.mxu1 %v3926_v43 }
 0x524   :  { %v906_v54 = vpack.c.bf16 %v4687_v49, %v4685_v50  ;;  %v917_v56 = vmul.f32 %v4687_v49, %v4687_v49  ;;  %v3729_v57 = vpop.f32.mrb[47].mxu1 }
 0x525   :  { %v3929_v57 = vld [vmem:[%s5300_s2 + $0x188] ss:$28 sps:$4 sm:$0xff]  }
 0x526   :  { %v926_v58 = vpack.c.bf16 %v917_v56, %v916_v52  ;;  %v3934_v52 = vld [vmem:[%s5300_s2 + $0x194] ss:$28 sps:$4 sm:$0xff]  }
 0x527   :  { %v3932_v56 = vld [vmem:[%s5300_s2 + $0x190] ss:$28 sps:$4 sm:$0xff]   ;;  %1539 = vmatprep.subr.bf16.mxu1 %v3934_v52 }
 0x528   :  { %942 = vmatprep.subr.bf16.mxu0 %v926_v58  ;;  %v3937_v58 = vld [vmem:[%s5300_s2 + $0x14] ss:$28 sps:$4 sm:$0xff]   ;;  %1540 = vmatpush1.bf16.msra.mxu1 %v3932_v56 }
 0x529   :  { %v4695_v59 = vpop.f32.mrb[48].mxu1  ;;  %943 = vmatpush1.bf16.msra.mxu0 %v906_v54  ;;  %v3931_v54 = vld [vmem:[%s5300_s2 + $0x18c] ss:$28 sps:$4 sm:$0xff]   ;;  %3742 = vmatprep.subr.bf16.mxu1 %v4149_v0 }
 0x52a   :  { %v3732_v60 = vpop.f32.mrb[49].mxu1  ;;  %v918_v1 = vmul.f32 %v4695_v59, %v4695_v59 }
 0x52b   :  { %v4697_v62 = vpop.f32.mrb[50].mxu1 }
 0x52c   :  { %v907_v2 = vpack.c.bf16 %v4697_v62, %v4695_v59  ;;  %v919_v3 = vmul.f32 %v4697_v62, %v4697_v62  ;;  %v3733_v4 = vpop.f32.mrb[51].mxu1 }
 0x52e   :  { %v927_v5 = vpack.c.bf16 %v919_v3, %v918_v1 }
 0x530   :  { %944 = vmatprep.subr.bf16.mxu0 %v927_v5 }
 0x531   :  { %v4705_v7 = vpop.f32.mrb[52].mxu1  ;;  %945 = vmatpush1.bf16.msra.mxu0 %v907_v2 }
 0x532   :  { %v3736_v9 = vpop.f32.mrb[53].mxu1  ;;  %v920_v12 = vmul.f32 %v4705_v7, %v4705_v7 }
 0x533   :  { %v4707_v11 = vpop.f32.mrb[54].mxu1 }
 0x534   :  { %v908_v13 = vpack.c.bf16 %v4707_v11, %v4705_v7  ;;  %v921_v14 = vmul.f32 %v4707_v11, %v4707_v11  ;;  %v3737_v53 = vpop.f32.mrb[55].mxu1 }
 0x536   :  { %v928_v55 = vpack.c.bf16 %v921_v14, %v920_v12 }
 0x538   :  { %946 = vmatprep.subr.bf16.mxu0 %v928_v55 }
 0x539   :  { %v4715_v61 = vpop.f32.mrb[56].mxu1  ;;  %947 = vmatpush1.bf16.msra.mxu0 %v908_v13 }
 0x53a   :  { %v909_v63 = vpack.c.bf16 %v4715_v61, %v4715_v61  ;;  %v922_v6 = vmul.f32 %v4715_v61, %v4715_v61  ;;  %v3740_v8 = vpop.f32.mrb[57].mxu1 }
 0x53b   :  { %v898_v15 = vpop.f32.mrb[58].mxu1 }
 0x53c   :  { %v929_v18 = vpack.c.bf16 %v922_v6, %v922_v6  ;;  %v3741_v20 = vpop.f32.mrb[59].mxu1  ;;  %v931_v22 = vsel %vm281_vm1, %v909_v63, 0 }
 0x53e   :  { %3185 = vmatprep.subr.msk.bf16.mxu0 %vm281_vm1, %v929_v18 }
 0x53f   :  { %949 = vmatpush1.bf16.msra.mxu0 %v931_v22 }
 0x540   :  { %1424 = vmatprep.subr.bf16.mxu0 %v3895_v23 }
 0x542   :  { %3186 = vmatmul.mubr.msk.bf16.vlgmr.msra.gmra.mrb[32].mxu0 %vm277_vm2, %v4152_v10  ;;  %v3899_v10 = vld [vmem:[%s5300_s2 + $0x38] ss:$28 sps:$4 sm:$0xff]  }
 0x543   :  { %1456 = vmatprep.mubr.bf16.mxu0 %v4151_v16  ;;  %1425 = vmatpush1.bf16.msra.mxu0 %v3893_v26 }
 0x544   :  { %1426 = vmatprep.subr.bf16.mxu0 %v3901_v21 }
 0x547   :  { %1427 = vmatpush1.bf16.msra.mxu0 %v3899_v10 }
 0x548   :  { %1428 = vmatprep.subr.bf16.mxu0 %v3904_v30 }
 0x54b   :  { %1429 = vmatpush1.bf16.msra.mxu0 %v3902_v34 }
 0x54c   :  { %1430 = vmatprep.subr.bf16.mxu0 %v3910_v40 }
 0x54f   :  { %1431 = vmatpush1.bf16.msra.mxu0 %v3908_v38 }
 0x550   :  { %1432 = vmatprep.subr.bf16.mxu0 %v3916_v45 }
 0x553   :  { %1433 = vmatpush1.bf16.msra.mxu0 %v3914_v47 }
 0x554   :  { %1434 = vmatprep.subr.bf16.mxu0 %v3919_v25 }
 0x557   :  { %1435 = vmatpush1.bf16.msra.mxu0 %v3917_v35 }
 0x558   :  { %1436 = vmatprep.subr.bf16.mxu0 %v3925_v48 }
 0x55b   :  { %1437 = vmatpush1.bf16.msra.mxu0 %v3923_v51 }
 0x55c   :  { %1438 = vmatprep.subr.bf16.mxu0 %v3931_v54 }
 0x55f   :  { %1439 = vmatpush1.bf16.msra.mxu0 %v3929_v57 }
 0x560   :  { %1626 = vmatprep.subr.bf16.mxu0 %v3937_v58  ;;  %v3935_v58 = vld [vmem:[%s5300_s2 + $0x10] ss:$28 sps:$4 sm:$0xff]  }
 0x615   :  { %v970_v60 = vpop.f32.mrb[32].mxu0 }
 0x616   :  { %v977_v1 = vmul.f32 0.01, %v970_v60  ;;  %v972_v2 = vpop.f32.mrb[33].mxu0 }
 0x617   :  { %v978_v3 = vmul.f32 0.01, %v972_v2  ;;  %v974_v4 = vpop.f32.mrb[34].mxu0 }
 0x618   :  { %v979_v5 = vmul.f32 %v977_v1, %v977_v1  ;;  %v4815_v9 = vrot.slane %v977_v1, %v4380_v24  ;;  %v975_v12 = vpop.f32.mrb[35].mxu0  ;;  %v3941_v1 = vld [vmem:[%s5300_s2 + $0x18] ss:$28 sps:$4 sm:$0xff]   ;;  %v3940_v4 = vld [vmem:[%s5300_s2 + $0x4c] ss:$28 sps:$4 sm:$0xff]  }
 0x61a   :  { %v980_v13 = vsub.f32 %v978_v3, %v979_v5  ;;  %v986_v14 = vsub.f32 %v4655_v29, %v4815_v9  ;;  %v987_v53 = vsub.f32 %v4657_v31, %v4815_v9  ;;  %v988_v55 = vsub.f32 %v4665_v39, %v4815_v9 }
 0x61b   :  { %v989_v63 = vsub.f32 %v4667_v42, %v4815_v9  ;;  %v990_v6 = vsub.f32 %v4675_v19, %v4815_v9  ;;  %v991_v8 = vsub.f32 %v4677_v27, %v4815_v9  ;;  %v992_v15 = vsub.f32 %v4685_v50, %v4815_v9 }
 0x61c   :  { %v981_v18 = vmax.f32 %v980_v13, 0.0  ;;  %v993_v29 = vsub.f32 %v4687_v49, %v4815_v9  ;;  %v994_v31 = vsub.f32 %v4695_v59, %v4815_v9  ;;  %v995_v39 = vsub.f32 %v4697_v62, %v4815_v9  ;;  %v4847_v59 = vld [vmem:[%s5301_s3 + $0x4] ss:$0 sm:$0xff] }
 0x61d   :  { %v996_v42 = vsub.f32 %v4705_v7, %v4815_v9  ;;  %v997_v19 = vsub.f32 %v4707_v11, %v4815_v9  ;;  %v998_v27 = vsub.f32 %v4715_v61, %v4815_v9  ;;  %v4852_v11 = vld [vmem:[%s5301_s3 + $0x5] ss:$0 sm:$0xff] }
 0x61e   :  { %v999_v50 = vadd.f32 1e-05, %v981_v18 }
 0x620   :  { %4094 = vrsqrt.f32 %v999_v50 }
 0x62a   :  { %v4095_v20 = vpop.eup %4094 }
 0x62b   :  { %v1004_v49 = vrot.slane %v4095_v20, %v4380_v24 }
 0x62d   :  { %v1005_v62 = vmul.f32 %v1004_v49, %v986_v14  ;;  %v1006_v22 = vmul.f32 %v1004_v49, %v987_v53  ;;  %v1007_v23 = vmul.f32 %v1004_v49, %v988_v55  ;;  %v1008_v7 = vmul.f32 %v1004_v49, %v989_v63 }
 0x62e   :  { %v1009_v61 = vmul.f32 %v1004_v49, %v990_v6  ;;  %v1010_v26 = vmul.f32 %v1004_v49, %v991_v8  ;;  %v1011_v21 = vmul.f32 %v1004_v49, %v992_v15  ;;  %v1012_v10 = vmul.f32 %v1004_v49, %v993_v29  ;;  %v3938_v8 = vld [vmem:[%s5300_s2 + $0x48] ss:$28 sps:$4 sm:$0xff]   ;;  %v3945_v15 = vld [vmem:[%s5300_s2 + $0x50] ss:$28 sps:$4 sm:$0xff]  }
 0x62f   :  { %v1022_v24 = vmul.f32 %v4847_v59, %v1005_v62  ;;  %v1023_v28 = vmul.f32 %v4847_v59, %v1006_v22  ;;  %v1024_v30 = vmul.f32 %v4847_v59, %v1007_v23  ;;  %v1025_v32 = vmul.f32 %v4847_v59, %v1008_v7  ;;  %v3949_v62 = vld [vmem:[%s5300_s2 + $0x88] ss:$28 sps:$4 sm:$0xff]   ;;  %v3948_v23 = vld [vmem:[%s5300_s2 + $0xbc] ss:$28 sps:$4 sm:$0xff]  }
 0x630   :  { %v1026_v34 = vmul.f32 %v4847_v59, %v1009_v61  ;;  %v1027_v36 = vmul.f32 %v4847_v59, %v1010_v26  ;;  %v1028_v37 = vmul.f32 %v4847_v59, %v1011_v21  ;;  %v1029_v38 = vmul.f32 %v4847_v59, %v1012_v10  ;;  %v3946_v61 = vld [vmem:[%s5300_s2 + $0xb8] ss:$28 sps:$4 sm:$0xff]   ;;  %v3953_v26 = vld [vmem:[%s5300_s2 + $0xc0] ss:$28 sps:$4 sm:$0xff]   ;;  %v3950_v10 = vld [vmem:[%s5300_s2 + $0xf0] ss:$28 sps:$4 sm:$0xff]  }
 0x631   :  { %v1039_v40 = vadd.f32 %v4852_v11, %v1022_v24  ;;  %v1040_v44 = vadd.f32 %v4852_v11, %v1023_v28  ;;  %v1041_v45 = vadd.f32 %v4852_v11, %v1024_v30  ;;  %v1042_v46 = vadd.f32 %v4852_v11, %v1025_v32  ;;  %v3952_v21 = vld [vmem:[%s5300_s2 + $0xf4] ss:$28 sps:$4 sm:$0xff]   ;;  %v3956_v28 = vld [vmem:[%s5300_s2 + $0x12c] ss:$28 sps:$4 sm:$0xff]  }
 0x632   :  { %v1043_v47 = vadd.f32 %v4852_v11, %v1026_v34  ;;  %v1044_v17 = vadd.f32 %v4852_v11, %v1027_v36  ;;  %v1045_v25 = vadd.f32 %v4852_v11, %v1028_v37  ;;  %v1046_v33 = vadd.f32 %v4852_v11, %v1029_v38  ;;  %v3957_v24 = vld [vmem:[%s5300_s2 + $0xf8] ss:$28 sps:$4 sm:$0xff]   ;;  %v3954_v30 = vld [vmem:[%s5300_s2 + $0x128] ss:$28 sps:$4 sm:$0xff]   ;;  %v3958_v32 = vld [vmem:[%s5300_s2 + $0x130] ss:$28 sps:$4 sm:$0xff]  }
 0x633   :  { %v1052_v35 = vmax.f32 %v1039_v40, 0.0  ;;  %v1053_v41 = vmax.f32 %v1040_v44, 0.0  ;;  %v1054_v48 = vmax.f32 %v1041_v45, 0.0  ;;  %v1055_v43 = vmax.f32 %v1042_v46, 0.0  ;;  %v3961_v34 = vld [vmem:[%s5300_s2 + $0x164] ss:$28 sps:$4 sm:$0xff]  }
 0x634   :  { %v1056_v51 = vmax.f32 %v1043_v47, 0.0  ;;  %v1057_v52 = vmax.f32 %v1044_v17, 0.0  ;;  %v1058_v54 = vmax.f32 %v1045_v25, 0.0  ;;  %v1059_v56 = vmax.f32 %v1046_v33, 0.0  ;;  %v3959_v36 = vld [vmem:[%s5300_s2 + $0x160] ss:$28 sps:$4 sm:$0xff]  }
 0x635   :  { %v4870_v57 = vpack.c.bf16 %v1053_v41, %v1052_v35  ;;  %v4875_v60 = vpack.c.bf16 %v1055_v43, %v1054_v48  ;;  %v1013_v2 = vmul.f32 %v1004_v49, %v994_v31  ;;  %v1014_v3 = vmul.f32 %v1004_v49, %v995_v39  ;;  %v3944_v31 = vld [vmem:[%s5300_s2 + $0x84] ss:$28 sps:$4 sm:$0xff]   ;;  %v3965_v38 = vld [vmem:[%s5300_s2 + $0x19c] ss:$28 sps:$4 sm:$0xff]   ;;  %v3971_v35 = vld [vmem:[%s5303_s5 + $0x48] sm:$0xff]  }
 0x636   :  { %v4883_v5 = vpack.c.bf16 %v1057_v52, %v1056_v51  ;;  %v4885_v9 = vpack.c.bf16 %v1059_v56, %v1058_v54  ;;  %v1015_v12 = vmul.f32 %v1004_v49, %v996_v42  ;;  %v1016_v13 = vmul.f32 %v1004_v49, %v997_v19  ;;  %v3962_v37 = vld [vmem:[%s5300_s2 + $0x168] ss:$28 sps:$4 sm:$0xff]   ;;  %v3963_v40 = vld [vmem:[%s5300_s2 + $0x198] ss:$28 sps:$4 sm:$0xff]   ;;  %v3966_v44 = vld [vmem:[%s5300_s2 + $0x1a0] ss:$28 sps:$4 sm:$0xff]  }
 0x637   :  { %1457 = vmatmul.mubr.bf16.vlgmr.msra.gmra.mrb[36].mxu0 %v4870_v57  ;;  %1558 = vmatmul.mubr.bf16.vlgmr.msra.gmra.mrb[60].mxu1 %v4870_v57  ;;  %v1030_v14 = vmul.f32 %v4847_v59, %v1013_v2  ;;  %v1031_v53 = vmul.f32 %v4847_v59, %v1014_v3  ;;  %v4891_v55 = vmul.f32 %v1004_v49, %v998_v27  ;;  %v3942_v49 = vld [vmem:[%s5300_s2 + $0x80] ss:$28 sps:$4 sm:$0xff]   ;;  %v3973_v41 = vld [vmem:[%s5303_s5 + $0xc8] sm:$0xff]   ;;  %v3975_v51 = vld [vmem:[%s5303_s5 + $0x50] sm:$0xff]  }
 0x638   :  { %1466 = vmatprep.mubr.bf16.mxu0 %v4151_v16  ;;  %1567 = vmatprep.mubr.bf16.mxu1 %v4151_v16  ;;  %v1032_v63 = vmul.f32 %v4847_v59, %v1015_v12  ;;  %v1033_v6 = vmul.f32 %v4847_v59, %v1016_v13  ;;  %v3967_v45 = vld [vmem:[%s5303_s5 + $0x40] sm:$0xff]   ;;  %v3972_v48 = vld [vmem:[%s5303_s5 + $0x8] sm:$0xff]   ;;  %v3977_v52 = vld [vmem:[%s5303_s5 + $0xd0] sm:$0xff]  }
 0x639   :  { %1627 = vmatpush1.bf16.msra.mxu0 %v3935_v58  ;;  %3743 = vmatpush3.bf16.msra.mxu1 %v3941_v1  ;;  %v1047_v18 = vadd.f32 %v4852_v11, %v1030_v14  ;;  %v1048_v29 = vadd.f32 %v4852_v11, %v1031_v53  ;;  %v3969_v46 = vld [vmem:[%s5303_s5 + $0xc0] sm:$0xff]   ;;  %v1034_v47 = vmul.f32 %v4847_v59, %v4891_v55  ;;  %v3974_v43 = vld [vmem:[%s5303_s5 + $0x88] sm:$0xff]   ;;  %v3976_v54 = vld [vmem:[%s5303_s5 + $0x10] sm:$0xff]  }
 0x63a   :  { %1628 = vmatprep.subr.bf16.mxu0 %v3940_v4  ;;  %3744 = vmatprep.subr.bf16.mxu1 %v4149_v0  ;;  %v1049_v39 = vadd.f32 %v4852_v11, %v1032_v63  ;;  %v1050_v42 = vadd.f32 %v4852_v11, %v1033_v6  ;;  %v3968_v59 = vld [vmem:[%s5303_s5] sm:$0xff]   ;;  %v3978_v56 = vld [vmem:[%s5303_s5 + $0x90] sm:$0xff]   ;;  %v3981_v58 = vld [vmem:[%s5303_s5 + $0xd8] sm:$0xff]  }
 0x63b   :  { %v1060_v19 = vmax.f32 %v1047_v18, 0.0  ;;  %v1061_v27 = vmax.f32 %v1048_v29, 0.0  ;;  %v1051_v17 = vadd.f32 %v4852_v11, %v1034_v47  ;;  %v3970_v11 = vld [vmem:[%s5303_s5 + $0x80] sm:$0xff]   ;;  %v3980_v1 = vld [vmem:[%s5303_s5 + $0x18] sm:$0xff]   ;;  %v3987_v13 = vld [vmem:[%s5303_s5 + $0x68] sm:$0xff]  }
 0x63c   :  { %v1062_v50 = vmax.f32 %v1049_v39, 0.0  ;;  %v1063_v20 = vmax.f32 %v1050_v42, 0.0  ;;  %v3982_v2 = vld [vmem:[%s5303_s5 + $0x98] sm:$0xff]   ;;  %v3985_v3 = vld [vmem:[%s5303_s5 + $0xe0] sm:$0xff]   ;;  %v3989_v14 = vld [vmem:[%s5303_s5 + $0xe8] sm:$0xff]  }
 0x63d   :  { %1629 = vmatpush1.bf16.msra.mxu0 %v3938_v8  ;;  %3745 = vmatpush3.bf16.msra.mxu1 %v3945_v15  ;;  %v4917_v22 = vpack.c.bf16 %v1061_v27, %v1060_v19  ;;  %v1064_v25 = vmax.f32 %v1051_v17, 0.0  ;;  %v3984_v4 = vld [vmem:[%s5303_s5 + $0x20] sm:$0xff]   ;;  %v3988_v53 = vld [vmem:[%s5303_s5 + $0x28] sm:$0xff]   ;;  %v3992_v63 = vld [vmem:[%s5303_s5 + $0xf0] sm:$0xff]  }
 0x63e   :  { %1630 = vmatprep.subr.bf16.mxu0 %v3944_v31  ;;  %3746 = vmatprep.subr.bf16.mxu1 %v4149_v0  ;;  %v4923_v7 = vpack.c.bf16 %v1063_v20, %v1062_v50  ;;  %v3986_v12 = vld [vmem:[%s5303_s5 + $0xa0] sm:$0xff]   ;;  %v3990_v55 = vld [vmem:[%s5303_s5 + $0xa8] sm:$0xff]   ;;  %v3998_v6 = vld [vmem:[%s5303_s5 + $0xb0] sm:$0xff]  }
 0x63f   :  { %1467 = vmatmul.mubr.bf16.gmra.mrb[40].mxu0 %v4875_v60  ;;  %1568 = vmatmul.mubr.bf16.gmra.mrb[64].mxu1 %v4875_v60  ;;  %v5001_v33 = vpack.c.bf16 %v1064_v25, %v1064_v25  ;;  %v4001_v8 = vld [vmem:[%s5303_s5 + $0x78] sm:$0xff]   ;;  %v4011_v31 = vld [vmem:[%s5303_s5 + $0x140] sm:$0xff]   ;;  %v4009_v47 = vld [vmem:[#allocation2 + $0x3c] ss:$28 sps:$4 sm:$0xff]  }
 0x640   :  { %1476 = vmatprep.mubr.bf16.mxu0 %v4151_v16  ;;  %1577 = vmatprep.mubr.bf16.mxu1 %v4151_v16  ;;  %v4002_v15 = vld [vmem:[%s5303_s5 + $0xf8] sm:$0xff]  }
 0x641   :  { %1631 = vmatpush1.bf16.msra.mxu0 %v3942_v49  ;;  %3747 = vmatpush3.bf16.msra.mxu1 %v3949_v62  ;;  %v4003_v18 = vld [vmem:[%s5303_s5 + $0x38] sm:$0xff]  }
 0x642   :  { %1632 = vmatprep.subr.bf16.mxu0 %v3948_v23  ;;  %3748 = vmatprep.subr.bf16.mxu1 %v4149_v0  ;;  %v4004_v29 = vld [vmem:[%s5303_s5 + $0xb8] sm:$0xff]  }
 0x643   :  { %v3999_v49 = vld [vmem:[#allocation2 + $0x4] ss:$28 sps:$4 sm:$0xff]  }
 0x645   :  { %1633 = vmatpush1.bf16.msra.mxu0 %v3946_v61  ;;  %3749 = vmatpush3.bf16.msra.mxu1 %v3953_v26 }
 0x646   :  { %1634 = vmatprep.subr.bf16.mxu0 %v3952_v21  ;;  %3750 = vmatprep.subr.bf16.mxu1 %v4149_v0 }
 0x647   :  { %1477 = vmatmul.mubr.bf16.gmra.mrb[44].mxu0 %v4883_v5  ;;  %1578 = vmatmul.mubr.bf16.gmra.mrb[68].mxu1 %v4883_v5 }
 0x648   :  { %1486 = vmatprep.mubr.bf16.mxu0 %v4151_v16  ;;  %1587 = vmatprep.mubr.bf16.mxu1 %v4151_v16 }
 0x649   :  { %1635 = vmatpush1.bf16.msra.mxu0 %v3950_v10  ;;  %3751 = vmatpush3.bf16.msra.mxu1 %v3957_v24 }
 0x64a   :  { %1636 = vmatprep.subr.bf16.mxu0 %v3956_v28  ;;  %3752 = vmatprep.subr.bf16.mxu1 %v4149_v0 }
 0x64d   :  { %1637 = vmatpush1.bf16.msra.mxu0 %v3954_v30  ;;  %3753 = vmatpush3.bf16.msra.mxu1 %v3958_v32  ;;  %v4012_v30 = vld [vmem:[%s5303_s5 + $0x100] sm:$0xff]  }
 0x64e   :  { %1638 = vmatprep.subr.bf16.mxu0 %v3961_v34  ;;  %3754 = vmatprep.subr.bf16.mxu1 %v4149_v0  ;;  %v4019_v32 = vld [vmem:[%s5303_s5 + $0x180] sm:$0xff]  }
 0x64f   :  { %1487 = vmatmul.mubr.bf16.gmra.mrb[48].mxu0 %v4885_v9  ;;  %1588 = vmatmul.mubr.bf16.gmra.mrb[72].mxu1 %v4885_v9 }
 0x650   :  { %1496 = vmatprep.mubr.bf16.mxu0 %v4151_v16  ;;  %1597 = vmatprep.mubr.bf16.mxu1 %v4151_v16 }
 0x651   :  { %1639 = vmatpush1.bf16.msra.mxu0 %v3959_v36  ;;  %3755 = vmatpush3.bf16.msra.mxu1 %v3962_v37  ;;  %v4020_v37 = vld [vmem:[%s5303_s5 + $0x148] sm:$0xff]  }
 0x652   :  { %1640 = vmatprep.subr.bf16.mxu0 %v3965_v38  ;;  %3756 = vmatprep.subr.bf16.mxu1 %v4149_v0 }
 0x655   :  { %1641 = vmatpush1.bf16.msra.mxu0 %v3963_v40  ;;  %3757 = vmatpush3.bf16.msra.mxu1 %v3966_v44 }
 0x656   :  { %3413 = vmatprep.subr.bf16.mxu0 %v3967_v45  ;;  %3471 = vmatprep.subr.bf16.mxu1 %v3969_v46  ;;  %v4005_v46 = vld [vmem:[#allocation2 + $0x38] ss:$28 sps:$4 sm:$0xff]  }
 0x657   :  { %1497 = vmatmul.mubr.bf16.gmra.mrb[52].mxu0 %v4917_v22  ;;  %1598 = vmatmul.mubr.bf16.gmra.mrb[76].mxu1 %v4917_v22 }
 0x658   :  { %1506 = vmatprep.mubr.bf16.mxu0 %v4151_v16  ;;  %1607 = vmatprep.mubr.bf16.mxu1 %v4151_v16 }
 0x65f   :  { %1507 = vmatmul.mubr.bf16.gmra.mrb[56].mxu0 %v4923_v7  ;;  %1608 = vmatmul.mubr.bf16.gmra.mrb[80].mxu1 %v4923_v7 }
 0x660   :  { %1516 = vmatprep.mubr.bf16.mxu0 %v4151_v16  ;;  %1617 = vmatprep.mubr.bf16.mxu1 %v4151_v16 }
 0x667   :  { %1517 = vmatmul.mubr.bf16.gmra.mrb[60].mxu0 %v5001_v33  ;;  %1618 = vmatmul.mubr.bf16.gmra.mrb[84].mxu1 %v5001_v33 }
 0x668   :  { %1658 = vmatprep.mubr.bf16.mxu0 %v4151_v16  ;;  %3758 = vmatprep.mubr.msk.bf16.mxu1 %vm4150_vm0, %v4149_v0 }
 0x66f   :  { %1659 = vmatmul.mubr.bf16.vlgmr.msra.gmra.mrb[64].mxu0 %v4870_v57  ;;  %3759 = vmatmul.mubr.bf16.vlgmr.msra.gmra.mrb[88].mxu1 %v4870_v57  ;;  %v3979_v57 = vld [vmem:[%s5303_s5 + $0x58] sm:$0xff]  }
 0x670   :  { %1668 = vmatprep.mubr.bf16.mxu0 %v4151_v16  ;;  %3762 = vmatprep.mubr.msk.bf16.mxu1 %vm4150_vm0, %v4149_v0 }
 0x671   :  { %3414 = vmatpush3.bf16.msra.mxu0 %v3968_v59  ;;  %3472 = vmatpush3.bf16.msra.mxu1 %v3970_v11  ;;  %v4021_v59 = vld [vmem:[%s5303_s5 + $0x108] sm:$0xff]  }
 0x672   :  { %3415 = vmatprep.subr.bf16.mxu0 %v3971_v35  ;;  %3473 = vmatprep.subr.bf16.mxu1 %v3973_v41  ;;  %v4028_v11 = vld [vmem:[%s5303_s5 + $0x188] sm:$0xff]  }
 0x675   :  { %3416 = vmatpush3.bf16.msra.mxu0 %v3972_v48  ;;  %3474 = vmatpush3.bf16.msra.mxu1 %v3974_v43  ;;  %v4007_v48 = vld [vmem:[#allocation2 + $0x40] ss:$28 sps:$4 sm:$0xff]  }
 0x676   :  { %3417 = vmatprep.subr.bf16.mxu0 %v3975_v51  ;;  %3475 = vmatprep.subr.bf16.mxu1 %v3977_v52  ;;  %v4029_v52 = vld [vmem:[%s5303_s5 + $0x150] sm:$0xff]  }
 0x677   :  { %1669 = vmatmul.mubr.bf16.gmra.mrb[68].mxu0 %v4875_v60  ;;  %3763 = vmatmul.mubr.bf16.gmra.mrb[92].mxu1 %v4875_v60  ;;  %v3983_v60 = vld [vmem:[%s5303_s5 + $0x60] sm:$0xff]  }
 0x678   :  { %1678 = vmatprep.mubr.bf16.mxu0 %v4151_v16  ;;  %3766 = vmatprep.mubr.msk.bf16.mxu1 %vm4150_vm0, %v4149_v0 }
 0x679   :  { %3418 = vmatpush3.bf16.msra.mxu0 %v3976_v54  ;;  %3476 = vmatpush3.bf16.msra.mxu1 %v3978_v56 }
 0x67a   :  { %3419 = vmatprep.subr.bf16.mxu0 %v3979_v57  ;;  %3477 = vmatprep.subr.bf16.mxu1 %v3981_v58 }
 0x67d   :  { %3420 = vmatpush3.bf16.msra.mxu0 %v3980_v1  ;;  %3478 = vmatpush3.bf16.msra.mxu1 %v3982_v2  ;;  %v4030_v1 = vld [vmem:[%s5303_s5 + $0x110] sm:$0xff]  }
 0x67e   :  { %3421 = vmatprep.subr.bf16.mxu0 %v3983_v60  ;;  %3479 = vmatprep.subr.bf16.mxu1 %v3985_v3  ;;  %v4037_v2 = vld [vmem:[%s5303_s5 + $0x190] sm:$0xff]  }
 0x67f   :  { %1679 = vmatmul.mubr.bf16.gmra.mrb[72].mxu0 %v4883_v5  ;;  %3767 = vmatmul.mubr.bf16.gmra.mrb[96].mxu1 %v4883_v5  ;;  %v3991_v5 = vld [vmem:[%s5303_s5 + $0x70] sm:$0xff]  }
 0x680   :  { %1688 = vmatprep.mubr.bf16.mxu0 %v4151_v16  ;;  %3770 = vmatprep.mubr.msk.bf16.mxu1 %vm4150_vm0, %v4149_v0 }
 0x681   :  { %3422 = vmatpush3.bf16.msra.mxu0 %v3984_v4  ;;  %3480 = vmatpush3.bf16.msra.mxu1 %v3986_v12  ;;  %v4038_v4 = vld [vmem:[%s5303_s5 + $0x158] sm:$0xff]  }
 0x682   :  { %3423 = vmatprep.subr.bf16.mxu0 %v3987_v13  ;;  %3481 = vmatprep.subr.bf16.mxu1 %v3989_v14 }
 0x685   :  { %3424 = vmatpush3.bf16.msra.mxu0 %v3988_v53  ;;  %3482 = vmatpush3.bf16.msra.mxu1 %v3990_v55  ;;  %v4013_v55 = vld [vmem:[#allocation2 + $0x70] ss:$28 sps:$4 sm:$0xff]  }
 0x686   :  { %3425 = vmatprep.subr.bf16.mxu0 %v3991_v5  ;;  %3483 = vmatprep.subr.bf16.mxu1 %v3992_v63  ;;  %v4017_v5 = vld [vmem:[#allocation2 + $0x74] ss:$28 sps:$4 sm:$0xff]  }
 0x687   :  { %1689 = vmatmul.mubr.bf16.gmra.mrb[76].mxu0 %v4885_v9  ;;  %3771 = vmatmul.mubr.bf16.gmra.mrb[100].mxu1 %v4885_v9  ;;  %v3997_v9 = vld [vmem:[%s5303_s5 + $0x30] sm:$0xff]  }
 0x688   :  { %1698 = vmatprep.mubr.bf16.mxu0 %v4151_v16  ;;  %3774 = vmatprep.mubr.msk.bf16.mxu1 %vm4150_vm0, %v4149_v0 }
 0x689   :  { %3426 = vmatpush3.bf16.msra.mxu0 %v3997_v9  ;;  %3484 = vmatpush3.bf16.msra.mxu1 %v3998_v6  ;;  %v4018_v6 = vld [vmem:[#allocation2 + $0x7c] ss:$28 sps:$4 sm:$0xff]  }
 0x68a   :  { %3427 = vmatprep.subr.bf16.mxu0 %v4001_v8  ;;  %3485 = vmatprep.subr.bf16.mxu1 %v4002_v15  ;;  %v4039_v8 = vld [vmem:[%s5303_s5 + $0x118] sm:$0xff]  }
 0x68b   :  { %v4044_v15 = vld [vmem:[%s5303_s5 + $0x198] sm:$0xff]  }
 0x68d   :  { %3428 = vmatpush3.bf16.msra.mxu0 %v4003_v18  ;;  %3486 = vmatpush3.bf16.msra.mxu1 %v4004_v29 }
 0x68e   :  { %3786 = vmatprep.subr.bf16.mxu1 %v4149_v0  ;;  %3529 = vmatprep.subr.bf16.mxu0 %v4011_v31  ;;  %v4015_v31 = vld [vmem:[#allocation2 + $0x78] ss:$28 sps:$4 sm:$0xff]  }
 0x68f   :  { %1699 = vmatmul.mubr.bf16.gmra.mrb[80].mxu0 %v4917_v22  ;;  %3775 = vmatmul.mubr.bf16.gmra.mrb[104].mxu1 %v4917_v22  ;;  %v3993_v22 = vld [vmem:[#allocation2] ss:$28 sps:$4 sm:$0xff]  }
 0x690   :  { %1708 = vmatprep.mubr.bf16.mxu0 %v4151_v16  ;;  %3778 = vmatprep.mubr.msk.bf16.mxu1 %vm4150_vm0, %v4149_v0 }
 0x697   :  { %1709 = vmatmul.mubr.bf16.gmra.mrb[84].mxu0 %v4923_v7  ;;  %3779 = vmatmul.mubr.bf16.gmra.mrb[108].mxu1 %v4923_v7  ;;  %v3995_v7 = vld [vmem:[#allocation2 + $0x8] ss:$28 sps:$4 sm:$0xff]  }
 0x698   :  { %1718 = vmatprep.mubr.bf16.mxu0 %v4151_v16  ;;  %3782 = vmatprep.mubr.msk.bf16.mxu1 %vm4150_vm0, %v4149_v0  ;;  %v4000_v16 = vld [vmem:[#allocation2 + $0xc] ss:$28 sps:$4 sm:$0xff]  }
 0x69f   :  { %1719 = vmatmul.mubr.bf16.gmra.mrb[88].mxu0 %v5001_v33  ;;  %3783 = vmatmul.mubr.bf16.gmra.mrb[112].mxu1 %v5001_v33  ;;  %v4010_v33 = vld [vmem:[#allocation2 + $0x44] ss:$28 sps:$4 sm:$0xff]  }
 0x70a   :  { %v1458_v39 = vpop.f32.mrb[36].mxu0  ;;  %v1559_v42 = vpop.f32.mrb[60].mxu1 }
 0x70b   :  { %v1460_v19 = vpop.f32.mrb[37].mxu0  ;;  %v1561_v27 = vpop.f32.mrb[61].mxu1 }
 0x70c   :  { %v1462_v50 = vpop.f32.mrb[38].mxu0  ;;  %v1563_v20 = vpop.f32.mrb[62].mxu1 }
 0x70d   :  { %v1815_v62 = vpack.c.bf16 %v1462_v50, %v1458_v39  ;;  %v1817_v23 = vpack.c.bf16 %v1563_v20, %v1559_v42  ;;  %v1464_v61 = vpop.f32.mrb[39].mxu0  ;;  %v1565_v26 = vpop.f32.mrb[63].mxu1 }
 0x70e   :  { %v1816_v21 = vpack.c.bf16 %v1464_v61, %v1460_v19  ;;  %v1818_v10 = vpack.c.bf16 %v1565_v26, %v1561_v27  ;;  %v4047_v19 = vld [vmem:[%s5303_s5 + $0x160] sm:$0xff]  }
 0x70f   :  { %v2157_v34 = vmul.bf16 %v3993_v22, %v1815_v62  ;;  %v2159_v36 = vmul.bf16 %v3995_v7, %v1817_v23  ;;  %v4053_v62 = vld [vmem:[%s5303_s5 + $0x1a0] sm:$0xff]   ;;  %v4054_v7 = vld [vmem:[%s5303_s5 + $0x168] sm:$0xff]  }
 0x710   :  { %v2158_v24 = vmul.bf16 %v3999_v49, %v1816_v21  ;;  %v2160_v28 = vmul.bf16 %v4000_v16, %v1818_v10  ;;  %v4048_v16 = vld [vmem:[%s5303_s5 + $0x120] sm:$0xff]  }
 0x712   :  { %v1468_v38 = vpop.f32.mrb[40].mxu0  ;;  %v1569_v40 = vpop.f32.mrb[64].mxu1  ;;  %2686 = vmatprep.mubr.bf16.mxu0 %v2158_v24  ;;  %2774 = vmatprep.mubr.bf16.mxu1 %v2160_v28  ;;  %v4022_v24 = vld [vmem:[#allocation2 + $0xa8] ss:$28 sps:$4 sm:$0xff]  }
 0x713   :  { %v1470_v44 = vpop.f32.mrb[41].mxu0  ;;  %v1571_v45 = vpop.f32.mrb[65].mxu1  ;;  %2687 = vmatmul.mubr.bf16.vlgmr.msra.gmra.mrb[92].mxu0 %v2157_v34  ;;  %2775 = vmatmul.mubr.bf16.vlgmr.msra.gmra.mrb[116].mxu1 %v2159_v36  ;;  %v4026_v28 = vld [vmem:[#allocation2 + $0xac] ss:$28 sps:$4 sm:$0xff]   ;;  %v4027_v34 = vld [vmem:[#allocation2 + $0xb4] ss:$28 sps:$4 sm:$0xff]  }
 0x714   :  { %v1472_v17 = vpop.f32.mrb[42].mxu0  ;;  %v1573_v25 = vpop.f32.mrb[66].mxu1  ;;  %3530 = vmatpush3.bf16.msra.mxu0 %v4012_v30  ;;  %3787 = vmatpush3.bf16.msra.mxu1 %v4019_v32  ;;  %v4055_v36 = vld [vmem:[%s5303_s5 + $0x128] sm:$0xff]  }
 0x715   :  { %v1822_v35 = vpack.c.bf16 %v1472_v17, %v1468_v38  ;;  %v1824_v41 = vpack.c.bf16 %v1573_v25, %v1569_v40  ;;  %v1474_v43 = vpop.f32.mrb[43].mxu0  ;;  %v1575_v51 = vpop.f32.mrb[67].mxu1  ;;  %3531 = vmatprep.subr.bf16.mxu0 %v4020_v37  ;;  %3788 = vmatprep.subr.bf16.mxu1 %v4149_v0  ;;  %v4056_v37 = vld [vmem:[%s5303_s5 + $0x1a8] sm:$0xff]  }
 0x716   :  { %v1823_v54 = vpack.c.bf16 %v1474_v43, %v1470_v44  ;;  %v1825_v56 = vpack.c.bf16 %v1575_v51, %v1571_v45  ;;  %v4024_v44 = vld [vmem:[#allocation2 + $0xb0] ss:$28 sps:$4 sm:$0xff]   ;;  %v4064_v43 = vld [vmem:[%s5303_s5 + $0x178] sm:$0xff]  }
 0x717   :  { %v2164_v60 = vmul.bf16 %v4005_v46, %v1822_v35  ;;  %v2166_v3 = vmul.bf16 %v4007_v48, %v1824_v41  ;;  %v4062_v35 = vld [vmem:[%s5303_s5 + $0x1b0] sm:$0xff]  }
 0x718   :  { %v2165_v57 = vmul.bf16 %v4009_v47, %v1823_v54  ;;  %v2167_v58 = vmul.bf16 %v4010_v33, %v1825_v56  ;;  %3532 = vmatpush3.bf16.msra.mxu0 %v4021_v59  ;;  %3789 = vmatpush3.bf16.msra.mxu1 %v4028_v11  ;;  %v4057_v47 = vld [vmem:[%s5303_s5 + $0x170] sm:$0xff]  }
 0x719   :  { %3533 = vmatprep.subr.bf16.mxu0 %v4029_v52  ;;  %3790 = vmatprep.subr.bf16.mxu1 %v4149_v0  ;;  %v4061_v11 = vld [vmem:[%s5303_s5 + $0x130] sm:$0xff]  }
 0x71a   :  { %v1478_v12 = vpop.f32.mrb[44].mxu0  ;;  %v1579_v13 = vpop.f32.mrb[68].mxu1  ;;  %2694 = vmatprep.mubr.bf16.mxu0 %v2165_v57  ;;  %2782 = vmatprep.mubr.bf16.mxu1 %v2167_v58  ;;  %v4035_v57 = vld [vmem:[#allocation2 + $0xe4] ss:$28 sps:$4 sm:$0xff]  }
 0x71b   :  { %v1480_v14 = vpop.f32.mrb[45].mxu0  ;;  %v1581_v53 = vpop.f32.mrb[69].mxu1  ;;  %2695 = vmatmul.mubr.bf16.gmra.mrb[96].mxu0 %v2164_v60  ;;  %2783 = vmatmul.mubr.bf16.gmra.mrb[120].mxu1 %v2166_v3  ;;  %v4065_v60 = vld [vmem:[%s5303_s5 + $0x138] sm:$0xff]  }
 0x71c   :  { %v1482_v63 = vpop.f32.mrb[46].mxu0  ;;  %v1583_v9 = vpop.f32.mrb[70].mxu1  ;;  %3534 = vmatpush3.bf16.msra.mxu0 %v4030_v1  ;;  %3791 = vmatpush3.bf16.msra.mxu1 %v4037_v2  ;;  %v4036_v2 = vld [vmem:[#allocation2 + $0xec] ss:$28 sps:$4 sm:$0xff]   ;;  %v4066_v3 = vld [vmem:[%s5303_s5 + $0x1b8] sm:$0xff]  }
 0x71d   :  { %v1829_v18 = vpack.c.bf16 %v1482_v63, %v1478_v12  ;;  %v1831_v29 = vpack.c.bf16 %v1583_v9, %v1579_v13  ;;  %v1484_v39 = vpop.f32.mrb[47].mxu0  ;;  %v1585_v42 = vpop.f32.mrb[71].mxu1  ;;  %3535 = vmatprep.subr.bf16.mxu0 %v4038_v4  ;;  %3792 = vmatprep.subr.bf16.mxu1 %v4149_v0  ;;  %v4031_v12 = vld [vmem:[#allocation2 + $0xe0] ss:$28 sps:$4 sm:$0xff]  }
 0x71e   :  { %v1830_v27 = vpack.c.bf16 %v1484_v39, %v1480_v14  ;;  %v1832_v50 = vpack.c.bf16 %v1585_v42, %v1581_v53  ;;  %v4033_v14 = vld [vmem:[#allocation2 + $0xe8] ss:$28 sps:$4 sm:$0xff]  }
 0x71f   :  { %v2171_v22 = vmul.bf16 %v4013_v55, %v1829_v18  ;;  %v2173_v23 = vmul.bf16 %v4015_v31, %v1831_v29 }
 0x720   :  { %v2172_v20 = vmul.bf16 %v4017_v5, %v1830_v27  ;;  %v2174_v49 = vmul.bf16 %v4018_v6, %v1832_v50  ;;  %3536 = vmatpush3.bf16.msra.mxu0 %v4039_v8  ;;  %3793 = vmatpush3.bf16.msra.mxu1 %v4044_v15  ;;  %v4045_v27 = vld [vmem:[#allocation2 + $0x11c] ss:$28 sps:$4 sm:$0xff]   ;;  %v4046_v50 = vld [vmem:[#allocation2 + $0x124] ss:$28 sps:$4 sm:$0xff]  }
 0x721   :  { %3537 = vmatprep.subr.bf16.mxu0 %v4047_v19  ;;  %3794 = vmatprep.subr.bf16.mxu1 %v4149_v0 }
 0x722   :  { %v1488_v61 = vpop.f32.mrb[48].mxu0  ;;  %v1589_v26 = vpop.f32.mrb[72].mxu1  ;;  %2702 = vmatprep.mubr.bf16.mxu0 %v2172_v20  ;;  %2790 = vmatprep.mubr.bf16.mxu1 %v2174_v49  ;;  %v4040_v49 = vld [vmem:[#allocation2 + $0x118] ss:$28 sps:$4 sm:$0xff]  }
 0x723   :  { %v1490_v21 = vpop.f32.mrb[49].mxu0  ;;  %v1591_v10 = vpop.f32.mrb[73].mxu1  ;;  %2703 = vmatmul.mubr.bf16.gmra.mrb[100].mxu0 %v2171_v22  ;;  %2791 = vmatmul.mubr.bf16.gmra.mrb[124].mxu1 %v2173_v23 }
 0x724   :  { %v1492_v30 = vpop.f32.mrb[50].mxu0  ;;  %v1593_v32 = vpop.f32.mrb[74].mxu1  ;;  %3538 = vmatpush3.bf16.msra.mxu0 %v4048_v16  ;;  %3795 = vmatpush3.bf16.msra.mxu1 %v4053_v62  ;;  %v4042_v62 = vld [vmem:[#allocation2 + $0x120] ss:$28 sps:$4 sm:$0xff]  }
 0x725   :  { %v1836_v38 = vpack.c.bf16 %v1492_v30, %v1488_v61  ;;  %v1838_v40 = vpack.c.bf16 %v1593_v32, %v1589_v26  ;;  %v1494_v45 = vpop.f32.mrb[51].mxu0  ;;  %v1595_v46 = vpop.f32.mrb[75].mxu1  ;;  %3539 = vmatprep.subr.bf16.mxu0 %v4054_v7  ;;  %3796 = vmatprep.subr.bf16.mxu1 %v4149_v0  ;;  %v1912_v26 = vld [vmem:[#allocation2 + $0x150] sm:$0x33] }
 0x726   :  { %v1837_v17 = vpack.c.bf16 %v1494_v45, %v1490_v21  ;;  %v1839_v25 = vpack.c.bf16 %v1595_v46, %v1591_v10  ;;  %v1913_v21 = vld [vmem:[#allocation2 + $0x158] sm:$0x33] }
 0x727   :  { %v2178_v41 = vmul.bf16 %v4022_v24, %v1836_v38  ;;  %v2180_v48 = vmul.bf16 %v4024_v44, %v1838_v40 }
 0x728   :  { %v2179_v33 = vmul.bf16 %v4026_v28, %v1837_v17  ;;  %v2181_v59 = vmul.bf16 %v4027_v34, %v1839_v25  ;;  %3540 = vmatpush3.bf16.msra.mxu0 %v4055_v36  ;;  %3797 = vmatpush3.bf16.msra.mxu1 %v4056_v37  ;;  %v3288_v36 = vcombine.high %v1912_v26, %v1912_v26 }
 0x729   :  { %3541 = vmatprep.subr.bf16.mxu0 %v4057_v47  ;;  %3798 = vmatprep.subr.bf16.mxu1 %v4149_v0  ;;  %v3290_v37 = vcombine.high %v1913_v21, %v1913_v21  ;;  %v3287_v25 = vcombine.low %v1912_v26, %v1912_v26 }
 0x72a   :  { %v1498_v51 = vpop.f32.mrb[52].mxu0  ;;  %v1599_v52 = vpop.f32.mrb[76].mxu1  ;;  %2710 = vmatprep.mubr.bf16.mxu0 %v2179_v33  ;;  %2798 = vmatprep.mubr.bf16.mxu1 %v2181_v59  ;;  %v3289_v59 = vcombine.low %v1913_v21, %v1913_v21 }
 0x72b   :  { %v1500_v54 = vpop.f32.mrb[53].mxu0  ;;  %v1601_v56 = vpop.f32.mrb[77].mxu1  ;;  %2711 = vmatmul.mubr.bf16.gmra.mrb[104].mxu0 %v2178_v41  ;;  %2799 = vmatmul.mubr.bf16.gmra.mrb[128].mxu1 %v2180_v48 }
 0x72c   :  { %v1502_v58 = vpop.f32.mrb[54].mxu0  ;;  %v1603_v1 = vpop.f32.mrb[78].mxu1  ;;  %3542 = vmatpush3.bf16.msra.mxu0 %v4061_v11  ;;  %3799 = vmatpush3.bf16.msra.mxu1 %v4062_v35 }
 0x72d   :  { %v1843_v4 = vpack.c.bf16 %v1502_v58, %v1498_v51  ;;  %v1845_v13 = vpack.c.bf16 %v1603_v1, %v1599_v52  ;;  %v1504_v53 = vpop.f32.mrb[55].mxu0  ;;  %v1605_v55 = vpop.f32.mrb[79].mxu1  ;;  %3543 = vmatprep.subr.bf16.mxu0 %v4064_v43  ;;  %3800 = vmatprep.subr.bf16.mxu1 %v4149_v0 }
 0x72e   :  { %v1844_v5 = vpack.c.bf16 %v1504_v53, %v1500_v54  ;;  %v1846_v63 = vpack.c.bf16 %v1605_v55, %v1601_v56 }
 0x72f   :  { %v2185_v8 = vmul.bf16 %v4031_v12, %v1843_v4  ;;  %v2187_v15 = vmul.bf16 %v4033_v14, %v1845_v13  ;;  %v4060_v12 = vld [vmem:[#allocation2 + $0x18] ss:$28 sps:$4 sm:$0xff]  }
 0x730   :  { %v2186_v9 = vmul.bf16 %v4035_v57, %v1844_v5  ;;  %v2188_v6 = vmul.bf16 %v4036_v2, %v1846_v63  ;;  %3544 = vmatpush3.bf16.msra.mxu0 %v4065_v60  ;;  %3801 = vmatpush3.bf16.msra.mxu1 %v4066_v3  ;;  %v4063_v2 = vld [vmem:[#allocation2 + $0x14] ss:$28 sps:$4 sm:$0xff]  }
 0x731   :  { %3830 = vmatprep.subr.bf16.mxu0 %v4149_v0  ;;  %v4058_v3 = vld [vmem:[#allocation2 + $0x10] ss:$28 sps:$4 sm:$0xff]  }
 0x732   :  { %v1508_v18 = vpop.f32.mrb[56].mxu0  ;;  %v1609_v29 = vpop.f32.mrb[80].mxu1  ;;  %2718 = vmatprep.mubr.bf16.mxu0 %v2186_v9  ;;  %2806 = vmatprep.mubr.bf16.mxu1 %v2188_v6 }
 0x733   :  { %v1510_v31 = vpop.f32.mrb[57].mxu0  ;;  %v1611_v39 = vpop.f32.mrb[81].mxu1  ;;  %2719 = vmatmul.mubr.bf16.gmra.mrb[108].mxu0 %v2185_v8  ;;  %2807 = vmatmul.mubr.bf16.gmra.mrb[132].mxu1 %v2187_v15 }
 0x734   :  { %v1512_v42 = vpop.f32.mrb[58].mxu0  ;;  %v1613_v19 = vpop.f32.mrb[82].mxu1 }
 0x735   :  { %v1850_v20 = vpack.c.bf16 %v1512_v42, %v1508_v18  ;;  %v1852_v16 = vpack.c.bf16 %v1613_v19, %v1609_v29  ;;  %v1514_v22 = vpop.f32.mrb[59].mxu0  ;;  %v1615_v23 = vpop.f32.mrb[83].mxu1  ;;  %v4067_v42 = vld [vmem:[#allocation2 + $0x48] ss:$28 sps:$4 sm:$0xff]  }
 0x736   :  { %v1851_v7 = vpack.c.bf16 %v1514_v22, %v1510_v31  ;;  %v1853_v61 = vpack.c.bf16 %v1615_v23, %v1611_v39  ;;  %v4070_v31 = vld [vmem:[#allocation2 + $0x4c] ss:$28 sps:$4 sm:$0xff]  }
 0x737   :  { %v2192_v28 = vmul.bf16 %v4040_v49, %v1850_v20  ;;  %v2194_v30 = vmul.bf16 %v4042_v62, %v1852_v16 }
 0x738   :  { %v2193_v10 = vmul.bf16 %v4045_v27, %v1851_v7  ;;  %v2195_v24 = vmul.bf16 %v4046_v50, %v1853_v61  ;;  %v4069_v27 = vld [vmem:[#allocation2 + $0x50] ss:$28 sps:$4 sm:$0xff]  }
 0x73a   :  { %v1518_v32 = vpop.f32.mrb[60].mxu0  ;;  %v1619_v34 = vpop.f32.mrb[84].mxu1  ;;  %2726 = vmatprep.mubr.bf16.mxu0 %v2193_v10  ;;  %2814 = vmatprep.mubr.bf16.mxu1 %v2195_v24  ;;  %v4074_v24 = vld [vmem:[#allocation2 + $0x84] ss:$28 sps:$4 sm:$0xff]  }
 0x73b   :  { %v1520_v38 = vpop.f32.mrb[61].mxu0  ;;  %v1621_v40 = vpop.f32.mrb[85].mxu1  ;;  %2727 = vmatmul.mubr.bf16.gmra.mrb[112].mxu0 %v2192_v28  ;;  %2815 = vmatmul.mubr.bf16.gmra.mrb[136].mxu1 %v2194_v30  ;;  %v1857_v17 = vpack.c.bf16 %v1518_v32, %v1518_v32  ;;  %v1859_v33 = vpack.c.bf16 %v1619_v34, %v1619_v34  ;;  %v4071_v30 = vld [vmem:[#allocation2 + $0x80] ss:$28 sps:$4 sm:$0xff]   ;;  %v4073_v34 = vld [vmem:[#allocation2 + $0x88] ss:$28 sps:$4 sm:$0xff]  }
 0x73c   :  { %v1858_v44 = vpack.c.bf16 %v1520_v38, %v1520_v38  ;;  %v1860_v45 = vpack.c.bf16 %v1621_v40, %v1621_v40  ;;  %v1522_v46 = vpop.f32.mrb[62].mxu0  ;;  %v1623_v47 = vpop.f32.mrb[86].mxu1 }
 0x73d   :  { %v1523_v11 = vpop.f32.mrb[63].mxu0  ;;  %v1624_v35 = vpop.f32.mrb[87].mxu1  ;;  %v2199_v43 = vmul.bf16 %v3287_v25, %v1857_v17  ;;  %v2201_v51 = vmul.bf16 %v3289_v59, %v1859_v33 }
 0x73e   :  { %v2200_v41 = vmul.bf16 %v3288_v36, %v1858_v44  ;;  %v2202_v48 = vmul.bf16 %v3290_v37, %v1860_v45  ;;  %v4078_v11 = vld [vmem:[#allocation2 + $0xbc] ss:$28 sps:$4 sm:$0xff]  }
 0x740   :  { %2734 = vmatprep.mubr.bf16.mxu0 %v2200_v41  ;;  %2822 = vmatprep.mubr.bf16.mxu1 %v2202_v48  ;;  %v4075_v41 = vld [vmem:[#allocation2 + $0xb8] ss:$28 sps:$4 sm:$0xff]  }
 0x742   :  { %v1660_v52 = vpop.f32.mrb[64].mxu0  ;;  %v1761_v54 = vpop.f32.mrb[88].mxu1 }
 0x743   :  { %v1662_v56 = vpop.f32.mrb[65].mxu0  ;;  %v3760_v57 = vpop.f32.mrb[89].mxu1  ;;  %2735 = vmatmul.mubr.bf16.gmra.mrb[116].mxu0 %v2199_v43  ;;  %2823 = vmatmul.mubr.bf16.gmra.mrb[140].mxu1 %v2201_v51  ;;  %v4077_v43 = vld [vmem:[#allocation2 + $0xc0] ss:$28 sps:$4 sm:$0xff]  }
 0x744   :  { %v1664_v58 = vpop.f32.mrb[66].mxu0  ;;  %v1764_v1 = vpop.f32.mrb[90].mxu1  ;;  %3802 = vmatprep.mubr.msk.bf16.mxu1 %vm4150_vm0, %v4149_v0 }
 0x745   :  { %v1819_v60 = vpack.c.bf16 %v1664_v58, %v1660_v52  ;;  %v1821_v4 = vpack.c.bf16 %v1764_v1, %v1761_v54  ;;  %v1666_v13 = vpop.f32.mrb[67].mxu0  ;;  %v3761_v14 = vpop.f32.mrb[91].mxu1 }
 0x746   :  { %v1820_v53 = vpack.c.bf16 %v1666_v13, %v1662_v56  ;;  %v4082_v13 = vld [vmem:[#allocation2 + $0xf4] ss:$28 sps:$4 sm:$0xff]  }
 0x747   :  { %v2161_v5 = vmul.bf16 %v4058_v3, %v1819_v60  ;;  %v2163_v63 = vmul.bf16 %v4060_v12, %v1821_v4 }
 0x748   :  { %v2162_v55 = vmul.bf16 %v4063_v2, %v1820_v53  ;;  %v4079_v53 = vld [vmem:[#allocation2 + $0xf0] ss:$28 sps:$4 sm:$0xff]  }
 0x74a   :  { %v1670_v9 = vpop.f32.mrb[68].mxu0  ;;  %v1769_v6 = vpop.f32.mrb[92].mxu1  ;;  %2862 = vmatprep.mubr.bf16.mxu0 %v2162_v55 }
 0x74b   :  { %v1672_v8 = vpop.f32.mrb[69].mxu0  ;;  %v3764_v15 = vpop.f32.mrb[93].mxu1  ;;  %2863 = vmatmul.mubr.bf16.vlgmr.msra.gmra.mrb[120].mxu0 %v2161_v5  ;;  %3803 = vmatmul.mubr.bf16.vlgmr.msra.gmra.mrb[144].mxu1 %v2163_v63  ;;  %v4081_v5 = vld [vmem:[#allocation2 + $0xf8] ss:$28 sps:$4 sm:$0xff]  }
 0x74c   :  { %v1674_v18 = vpop.f32.mrb[70].mxu0  ;;  %v1772_v29 = vpop.f32.mrb[94].mxu1  ;;  %3806 = vmatprep.mubr.msk.bf16.mxu1 %vm4150_vm0, %v4149_v0 }
 0x74d   :  { %v1826_v39 = vpack.c.bf16 %v1674_v18, %v1670_v9  ;;  %v1828_v19 = vpack.c.bf16 %v1772_v29, %v1769_v6  ;;  %v1676_v50 = vpop.f32.mrb[71].mxu0  ;;  %v3765_v20 = vpop.f32.mrb[95].mxu1 }
 0x74e   :  { %v1827_v49 = vpack.c.bf16 %v1676_v50, %v1672_v8  ;;  %v4086_v50 = vld [vmem:[#allocation2 + $0x12c] ss:$28 sps:$4 sm:$0xff]  }
 0x74f   :  { %v2168_v62 = vmul.bf16 %v4067_v42, %v1826_v39  ;;  %v2170_v22 = vmul.bf16 %v4069_v27, %v1828_v19 }
 0x750   :  { %v2169_v16 = vmul.bf16 %v4070_v31, %v1827_v49  ;;  %v4083_v49 = vld [vmem:[#allocation2 + $0x128] ss:$28 sps:$4 sm:$0xff]  }
 0x752   :  { %v1680_v23 = vpop.f32.mrb[72].mxu0  ;;  %v1777_v7 = vpop.f32.mrb[96].mxu1  ;;  %2870 = vmatprep.mubr.bf16.mxu0 %v2169_v16 }
 0x753   :  { %v1682_v61 = vpop.f32.mrb[73].mxu0  ;;  %v3768_v26 = vpop.f32.mrb[97].mxu1  ;;  %2871 = vmatmul.mubr.bf16.gmra.mrb[124].mxu0 %v2168_v62  ;;  %3807 = vmatmul.mubr.bf16.gmra.mrb[148].mxu1 %v2170_v22  ;;  %v4085_v62 = vld [vmem:[#allocation2 + $0x130] ss:$28 sps:$4 sm:$0xff]  }
 0x754   :  { %v1684_v21 = vpop.f32.mrb[74].mxu0  ;;  %v1780_v10 = vpop.f32.mrb[98].mxu1  ;;  %3810 = vmatprep.mubr.msk.bf16.mxu1 %vm4150_vm0, %v4149_v0 }
 0x755   :  { %v1833_v28 = vpack.c.bf16 %v1684_v21, %v1680_v23  ;;  %v1835_v32 = vpack.c.bf16 %v1780_v10, %v1777_v7  ;;  %v1686_v36 = vpop.f32.mrb[75].mxu0  ;;  %v3769_v37 = vpop.f32.mrb[99].mxu1 }
 0x756   :  { %v1834_v38 = vpack.c.bf16 %v1686_v36, %v1682_v61  ;;  %v1914_v61 = vld [vmem:[#allocation2 + $0x160] sm:$0x33] }
 0x757   :  { %v2175_v44 = vmul.bf16 %v4071_v30, %v1833_v28  ;;  %v2177_v45 = vmul.bf16 %v4073_v34, %v1835_v32  ;;  %v3292_v30 = vcombine.high %v1914_v61, %v1914_v61 }
 0x758   :  { %v2176_v40 = vmul.bf16 %v4074_v24, %v1834_v38 }
 0x75a   :  { %v1690_v46 = vpop.f32.mrb[76].mxu0  ;;  %v1785_v47 = vpop.f32.mrb[100].mxu1  ;;  %2878 = vmatprep.mubr.bf16.mxu0 %v2176_v40 }
 0x75b   :  { %v1692_v17 = vpop.f32.mrb[77].mxu0  ;;  %v3772_v25 = vpop.f32.mrb[101].mxu1  ;;  %2879 = vmatmul.mubr.bf16.gmra.mrb[128].mxu0 %v2175_v44  ;;  %3811 = vmatmul.mubr.bf16.gmra.mrb[152].mxu1 %v2177_v45  ;;  %v3291_v44 = vcombine.low %v1914_v61, %v1914_v61 }
 0x75c   :  { %v1694_v33 = vpop.f32.mrb[78].mxu0  ;;  %v1788_v59 = vpop.f32.mrb[102].mxu1  ;;  %3814 = vmatprep.mubr.msk.bf16.mxu1 %vm4150_vm0, %v4149_v0 }
 0x75d   :  { %v1840_v35 = vpack.c.bf16 %v1694_v33, %v1690_v46  ;;  %v1842_v48 = vpack.c.bf16 %v1788_v59, %v1785_v47  ;;  %v1696_v51 = vpop.f32.mrb[79].mxu0  ;;  %v3773_v52 = vpop.f32.mrb[103].mxu1  ;;  %v4088_v46 = vld [vmem:[#allocation2 + $0x168] ss:$0 sps:$4 sm:$0x33]  }
 0x75e   :  { %v1841_v54 = vpack.c.bf16 %v1696_v51, %v1692_v17 }
 0x75f   :  { %v2182_v57 = vmul.bf16 %v4075_v41, %v1840_v35  ;;  %v2184_v58 = vmul.bf16 %v4077_v43, %v1842_v48 }
 0x760   :  { %v2183_v56 = vmul.bf16 %v4078_v11, %v1841_v54 }
 0x762   :  { %v1700_v1 = vpop.f32.mrb[80].mxu0  ;;  %v1793_v2 = vpop.f32.mrb[104].mxu1  ;;  %2886 = vmatprep.mubr.bf16.mxu0 %v2183_v56 }
 0x763   :  { %v1702_v60 = vpop.f32.mrb[81].mxu0  ;;  %v3776_v3 = vpop.f32.mrb[105].mxu1  ;;  %2887 = vmatmul.mubr.bf16.gmra.mrb[132].mxu0 %v2182_v57  ;;  %3815 = vmatmul.mubr.bf16.gmra.mrb[156].mxu1 %v2184_v58 }
 0x764   :  { %v1704_v4 = vpop.f32.mrb[82].mxu0  ;;  %v1796_v12 = vpop.f32.mrb[106].mxu1  ;;  %3818 = vmatprep.mubr.msk.bf16.mxu1 %vm4150_vm0, %v4149_v0 }
 0x765   :  { %v1847_v14 = vpack.c.bf16 %v1704_v4, %v1700_v1  ;;  %v1849_v55 = vpack.c.bf16 %v1796_v12, %v1793_v2  ;;  %v1706_v63 = vpop.f32.mrb[83].mxu0  ;;  %v3777_v9 = vpop.f32.mrb[107].mxu1 }
 0x766   :  { %v1848_v6 = vpack.c.bf16 %v1706_v63, %v1702_v60 }
 0x767   :  { %v2189_v15 = vmul.bf16 %v4079_v53, %v1847_v14  ;;  %v2191_v18 = vmul.bf16 %v4081_v5, %v1849_v55 }
 0x768   :  { %v2190_v8 = vmul.bf16 %v4082_v13, %v1848_v6 }
 0x76a   :  { %v1710_v29 = vpop.f32.mrb[84].mxu0  ;;  %v1801_v31 = vpop.f32.mrb[108].mxu1  ;;  %2894 = vmatprep.mubr.bf16.mxu0 %v2190_v8 }
 0x76b   :  { %v1712_v39 = vpop.f32.mrb[85].mxu0  ;;  %v3780_v42 = vpop.f32.mrb[109].mxu1  ;;  %2895 = vmatmul.mubr.bf16.gmra.mrb[136].mxu0 %v2189_v15  ;;  %3819 = vmatmul.mubr.bf16.gmra.mrb[160].mxu1 %v2191_v18 }
 0x76c   :  { %v1714_v19 = vpop.f32.mrb[86].mxu0  ;;  %v1804_v27 = vpop.f32.mrb[110].mxu1  ;;  %3822 = vmatprep.mubr.msk.bf16.mxu1 %vm4150_vm0, %v4149_v0 }
 0x76d   :  { %v1854_v20 = vpack.c.bf16 %v1714_v19, %v1710_v29  ;;  %v1856_v16 = vpack.c.bf16 %v1804_v27, %v1801_v31  ;;  %v1716_v22 = vpop.f32.mrb[87].mxu0  ;;  %v3781_v23 = vpop.f32.mrb[111].mxu1 }
 0x76e   :  { %v1855_v7 = vpack.c.bf16 %v1716_v22, %v1712_v39 }
 0x76f   :  { %v2196_v21 = vmul.bf16 %v4083_v49, %v1854_v20  ;;  %v2198_v10 = vmul.bf16 %v4085_v62, %v1856_v16 }
 0x770   :  { %v2197_v26 = vmul.bf16 %v4086_v50, %v1855_v7 }
 0x772   :  { %v1720_v24 = vpop.f32.mrb[88].mxu0  ;;  %v1809_v28 = vpop.f32.mrb[112].mxu1  ;;  %2902 = vmatprep.mubr.bf16.mxu0 %v2197_v26 }
 0x773   :  { %v1722_v32 = vpop.f32.mrb[89].mxu0  ;;  %v3784_v34 = vpop.f32.mrb[113].mxu1  ;;  %2903 = vmatmul.mubr.bf16.gmra.mrb[140].mxu0 %v2196_v21  ;;  %3823 = vmatmul.mubr.bf16.gmra.mrb[164].mxu1 %v2198_v10  ;;  %v1861_v40 = vpack.c.bf16 %v1720_v24, %v1720_v24  ;;  %v1863_v45 = vpack.c.bf16 %v1809_v28, %v1809_v28 }
 0x774   :  { %v1862_v36 = vpack.c.bf16 %v1722_v32, %v1722_v32  ;;  %v1724_v37 = vpop.f32.mrb[90].mxu0  ;;  %v1812_v38 = vpop.f32.mrb[114].mxu1  ;;  %3826 = vmatprep.mubr.msk.bf16.mxu1 %vm4150_vm0, %v4149_v0 }
 0x775   :  { %v1725_v47 = vpop.f32.mrb[91].mxu0  ;;  %v3785_v17 = vpop.f32.mrb[115].mxu1  ;;  %v2203_v33 = vmul.bf16 %v3291_v44, %v1861_v40  ;;  %v2205_v59 = vmul.bf16 %v4088_v46, %v1863_v45 }
 0x776   :  { %v2204_v25 = vmul.bf16 %v3292_v30, %v1862_v36 }
 0x778   :  { %2910 = vmatprep.mubr.bf16.mxu0 %v2204_v25 }
 0x77b   :  { %2911 = vmatmul.mubr.bf16.gmra.mrb[144].mxu0 %v2203_v33  ;;  %3827 = vmatmul.mubr.bf16.gmra.mrb[168].mxu1 %v2205_v59 }
 0x77c   :  { %3844 = vmatprep.mubr.msk.bf16.mxu0 %vm4150_vm0, %v4149_v0 }
 0x7e6   :  { %v3429_v11 = vpop.f32.mrb[92].mxu0  ;;  %v3487_v35 = vpop.f32.mrb[116].mxu1 }
 0x7e7   :  { %v3430_v41 = vpop.f32.mrb[93].mxu0  ;;  %v3488_v48 = vpop.f32.mrb[117].mxu1 }
 0x7e8   :  { %v3431_v43 = vadd.f32 %v3430_v41, %v3429_v11  ;;  %v3489_v51 = vadd.f32 %v3488_v48, %v3487_v35  ;;  %v3432_v52 = vpop.f32.mrb[94].mxu0  ;;  %v3490_v54 = vpop.f32.mrb[118].mxu1 }
 0x7e9   :  { %v3433_v56 = vpop.f32.mrb[95].mxu0  ;;  %v3491_v57 = vpop.f32.mrb[119].mxu1 }
 0x7ea   :  { %v5227_v58 = vadd.f32 %v3489_v51, %v3431_v43  ;;  %v3434_v1 = vadd.f32 %v3433_v56, %v3432_v52  ;;  %v3492_v2 = vadd.f32 %v3491_v57, %v3490_v54 }
 0x7ec   :  { %v5229_v60 = vadd.f32 %v3492_v2, %v3434_v1 }
 0x7ee   :  { %v3435_v3 = vpop.f32.mrb[96].mxu0  ;;  %v3493_v4 = vpop.f32.mrb[120].mxu1 }
 0x7ef   :  { %v3436_v12 = vpop.f32.mrb[97].mxu0  ;;  %v3494_v13 = vpop.f32.mrb[121].mxu1 }
 0x7f0   :  { %v3437_v14 = vadd.f32 %v3436_v12, %v3435_v3  ;;  %v3495_v53 = vadd.f32 %v3494_v13, %v3493_v4  ;;  %v3438_v55 = vpop.f32.mrb[98].mxu0  ;;  %v3496_v5 = vpop.f32.mrb[122].mxu1 }
 0x7f1   :  { %v3439_v63 = vpop.f32.mrb[99].mxu0  ;;  %v3497_v9 = vpop.f32.mrb[123].mxu1 }
 0x7f2   :  { %v5231_v6 = vadd.f32 %v3495_v53, %v3437_v14  ;;  %v3440_v8 = vadd.f32 %v3439_v63, %v3438_v55  ;;  %v3498_v15 = vadd.f32 %v3497_v9, %v3496_v5 }
 0x7f4   :  { %v5233_v18 = vadd.f32 %v3498_v15, %v3440_v8 }
 0x7f6   :  { %v3441_v29 = vpop.f32.mrb[100].mxu0  ;;  %v3499_v31 = vpop.f32.mrb[124].mxu1 }
 0x7f7   :  { %v3442_v39 = vpop.f32.mrb[101].mxu0  ;;  %v3500_v42 = vpop.f32.mrb[125].mxu1 }
 0x7f8   :  { %v3443_v19 = vadd.f32 %v3442_v39, %v3441_v29  ;;  %v3501_v27 = vadd.f32 %v3500_v42, %v3499_v31  ;;  %v3444_v50 = vpop.f32.mrb[102].mxu0  ;;  %v3502_v20 = vpop.f32.mrb[126].mxu1 }
 0x7f9   :  { %v3445_v49 = vpop.f32.mrb[103].mxu0  ;;  %v3503_v16 = vpop.f32.mrb[127].mxu1 }
 0x7fa   :  { %v5235_v62 = vadd.f32 %v3501_v27, %v3443_v19  ;;  %v3446_v22 = vadd.f32 %v3445_v49, %v3444_v50  ;;  %v3504_v23 = vadd.f32 %v3503_v16, %v3502_v20 }
 0x7fc   :  { %v5237_v7 = vadd.f32 %v3504_v23, %v3446_v22 }
 0x7fe   :  { %v3447_v61 = vpop.f32.mrb[104].mxu0  ;;  %v3505_v26 = vpop.f32.mrb[128].mxu1 }
 0x7ff   :  { %v3448_v21 = vpop.f32.mrb[105].mxu0  ;;  %v3506_v10 = vpop.f32.mrb[129].mxu1 }
 0x800   :  { %v3449_v24 = vadd.f32 %v3448_v21, %v3447_v61  ;;  %v3507_v28 = vadd.f32 %v3506_v10, %v3505_v26  ;;  %v3450_v30 = vpop.f32.mrb[106].mxu0  ;;  %v3508_v32 = vpop.f32.mrb[130].mxu1 }
 0x801   :  { %v3451_v34 = vpop.f32.mrb[107].mxu0  ;;  %v3509_v36 = vpop.f32.mrb[131].mxu1 }
 0x802   :  { %v5239_v37 = vadd.f32 %v3507_v28, %v3449_v24  ;;  %v3452_v38 = vadd.f32 %v3451_v34, %v3450_v30  ;;  %v3510_v40 = vadd.f32 %v3509_v36, %v3508_v32 }
 0x804   :  { %v5241_v44 = vadd.f32 %v3510_v40, %v3452_v38 }
 0x806   :  { %v3453_v45 = vpop.f32.mrb[108].mxu0  ;;  %v3511_v46 = vpop.f32.mrb[132].mxu1 }
 0x807   :  { %v3454_v47 = vpop.f32.mrb[109].mxu0  ;;  %v3512_v17 = vpop.f32.mrb[133].mxu1 }
 0x808   :  { %v3455_v25 = vadd.f32 %v3454_v47, %v3453_v45  ;;  %v3513_v33 = vadd.f32 %v3512_v17, %v3511_v46  ;;  %v3456_v59 = vpop.f32.mrb[110].mxu0  ;;  %v3514_v11 = vpop.f32.mrb[134].mxu1 }
 0x809   :  { %v3457_v35 = vpop.f32.mrb[111].mxu0  ;;  %v3515_v41 = vpop.f32.mrb[135].mxu1 }
 0x80a   :  { %v5243_v48 = vadd.f32 %v3513_v33, %v3455_v25  ;;  %v3458_v43 = vadd.f32 %v3457_v35, %v3456_v59  ;;  %v3516_v51 = vadd.f32 %v3515_v41, %v3514_v11 }
 0x80c   :  { %v5245_v52 = vadd.f32 %v3516_v51, %v3458_v43 }
 0x80e   :  { %v3459_v54 = vpop.f32.mrb[112].mxu0  ;;  %v3517_v56 = vpop.f32.mrb[136].mxu1 }
 0x80f   :  { %v3460_v57 = vpop.f32.mrb[113].mxu0  ;;  %v3518_v1 = vpop.f32.mrb[137].mxu1 }
 0x810   :  { %v3461_v2 = vadd.f32 %v3460_v57, %v3459_v54  ;;  %v3519_v3 = vadd.f32 %v3518_v1, %v3517_v56  ;;  %v3462_v4 = vpop.f32.mrb[114].mxu0  ;;  %v3520_v12 = vpop.f32.mrb[138].mxu1 }
 0x811   :  { %v3463_v13 = vpop.f32.mrb[115].mxu0  ;;  %v3521_v14 = vpop.f32.mrb[139].mxu1 }
 0x812   :  { %v5247_v53 = vadd.f32 %v3519_v3, %v3461_v2  ;;  %v3464_v55 = vadd.f32 %v3463_v13, %v3462_v4  ;;  %v3522_v5 = vadd.f32 %v3521_v14, %v3520_v12 }
 0x814   :  { %v5249_v63 = vadd.f32 %v3522_v5, %v3464_v55 }
 0x816   :  { %v3465_v9 = vpop.f32.mrb[116].mxu0  ;;  %v3523_v8 = vpop.f32.mrb[140].mxu1 }
 0x817   :  { %v3466_v15 = vpop.f32.mrb[117].mxu0  ;;  %v3524_v29 = vpop.f32.mrb[141].mxu1 }
 0x818   :  { %v3467_v31 = vadd.f32 %v3466_v15, %v3465_v9  ;;  %v3525_v39 = vadd.f32 %v3524_v29, %v3523_v8  ;;  %v3468_v42 = vpop.f32.mrb[118].mxu0  ;;  %v3526_v19 = vpop.f32.mrb[142].mxu1 }
 0x819   :  { %v3469_v27 = vpop.f32.mrb[119].mxu0  ;;  %v3527_v50 = vpop.f32.mrb[143].mxu1 }
 0x81a   :  { %v5251_v20 = vadd.f32 %v3525_v39, %v3467_v31 }
 0x81e   :  { %v3545_v49 = vpop.f32.mrb[120].mxu0  ;;  %v2952_v16 = vpop.f32.mrb[144].mxu1 }
 0x81f   :  { %v3546_v22 = vpop.f32.mrb[121].mxu0  ;;  %v3804_v23 = vpop.f32.mrb[145].mxu1 }
 0x820   :  { %v3547_v61 = vadd.f32 %v3546_v22, %v3545_v49  ;;  %v3548_v26 = vpop.f32.mrb[122].mxu0  ;;  %v2955_v21 = vpop.f32.mrb[146].mxu1 }
 0x821   :  { %v3549_v10 = vpop.f32.mrb[123].mxu0  ;;  %v3805_v24 = vpop.f32.mrb[147].mxu1 }
 0x822   :  { %v2865_v28 = vadd.f32 %v3547_v61, %v5227_v58  ;;  %v3550_v30 = vadd.f32 %v3549_v10, %v3548_v26 }
 0x824   :  { %v2953_v32 = vadd.f32 %v2952_v16, %v2865_v28  ;;  %v2868_v34 = vadd.f32 %v3550_v30, %v5229_v60 }
 0x826   :  { %v2956_v36 = vadd.f32 %v2955_v21, %v2868_v34  ;;  %v3551_v38 = vpop.f32.mrb[124].mxu0  ;;  %v2960_v40 = vpop.f32.mrb[148].mxu1 }
 0x827   :  { %v3552_v45 = vpop.f32.mrb[125].mxu0  ;;  %v3808_v46 = vpop.f32.mrb[149].mxu1 }
 0x828   :  { %v3007_v47 = vpack.c.bf16 %v2956_v36, %v2953_v32  ;;  %v3553_v17 = vadd.f32 %v3552_v45, %v3551_v38  ;;  %v3554_v25 = vpop.f32.mrb[126].mxu0  ;;  %v2963_v33 = vpop.f32.mrb[150].mxu1 }
 0x829   :  { %v3555_v59 = vpop.f32.mrb[127].mxu0  ;;  %v3809_v11 = vpop.f32.mrb[151].mxu1 }
 0x82a   :  { %v2873_v35 = vadd.f32 %v3553_v17, %v5231_v6  ;;  %v3556_v41 = vadd.f32 %v3555_v59, %v3554_v25  ;;  %3831 = vmatpush3.bf16.msra.mxu0 %v3007_v47 }
 0x82b   :  { %3832 = vmatprep.subr.bf16.mxu0 %v4149_v0 }
 0x82c   :  { %v2961_v58 = vadd.f32 %v2960_v40, %v2873_v35  ;;  %v2876_v60 = vadd.f32 %v3556_v41, %v5233_v18 }
 0x82e   :  { %v2964_v43 = vadd.f32 %v2963_v33, %v2876_v60  ;;  %v3557_v51 = vpop.f32.mrb[128].mxu0  ;;  %v2968_v54 = vpop.f32.mrb[152].mxu1 }
 0x82f   :  { %v3558_v56 = vpop.f32.mrb[129].mxu0  ;;  %v3812_v57 = vpop.f32.mrb[153].mxu1 }
 0x830   :  { %v3008_v1 = vpack.c.bf16 %v2964_v43, %v2961_v58  ;;  %v3559_v2 = vadd.f32 %v3558_v56, %v3557_v51  ;;  %v3560_v3 = vpop.f32.mrb[130].mxu0  ;;  %v2971_v4 = vpop.f32.mrb[154].mxu1 }
 0x831   :  { %v3561_v12 = vpop.f32.mrb[131].mxu0  ;;  %v3813_v13 = vpop.f32.mrb[155].mxu1 }
 0x832   :  { %v2881_v6 = vadd.f32 %v3559_v2, %v5235_v62  ;;  %v3562_v14 = vadd.f32 %v3561_v12, %v3560_v3  ;;  %3833 = vmatpush3.bf16.msra.mxu0 %v3008_v1 }
 0x833   :  { %3834 = vmatprep.subr.bf16.mxu0 %v4149_v0 }
 0x834   :  { %v2969_v55 = vadd.f32 %v2968_v54, %v2881_v6  ;;  %v2884_v18 = vadd.f32 %v3562_v14, %v5237_v7 }
 0x836   :  { %v2972_v5 = vadd.f32 %v2971_v4, %v2884_v18  ;;  %v3563_v9 = vpop.f32.mrb[132].mxu0  ;;  %v2976_v8 = vpop.f32.mrb[156].mxu1 }
 0x837   :  { %v3564_v15 = vpop.f32.mrb[133].mxu0  ;;  %v3816_v29 = vpop.f32.mrb[157].mxu1 }
 0x838   :  { %v3009_v31 = vpack.c.bf16 %v2972_v5, %v2969_v55  ;;  %v3565_v39 = vadd.f32 %v3564_v15, %v3563_v9  ;;  %v3566_v42 = vpop.f32.mrb[134].mxu0  ;;  %v2979_v19 = vpop.f32.mrb[158].mxu1  ;;  %v3006_v55 = vld [vmem:[%s5304_s6] sm:$0x3] }
 0x839   :  { %v3567_v27 = vpop.f32.mrb[135].mxu0  ;;  %v3817_v50 = vpop.f32.mrb[159].mxu1 }
 0x83a   :  { %v2889_v62 = vadd.f32 %v3565_v39, %v5239_v37  ;;  %v3568_v49 = vadd.f32 %v3567_v27, %v3566_v42  ;;  %3835 = vmatpush3.bf16.msra.mxu0 %v3009_v31 }
 0x83b   :  { %3836 = vmatprep.subr.bf16.mxu0 %v4149_v0 }
 0x83c   :  { %v2977_v16 = vadd.f32 %v2976_v8, %v2889_v62  ;;  %v2892_v7 = vadd.f32 %v3568_v49, %v5241_v44 }
 0x83e   :  { %v2980_v22 = vadd.f32 %v2979_v19, %v2892_v7  ;;  %v3569_v23 = vpop.f32.mrb[136].mxu0  ;;  %v2984_v61 = vpop.f32.mrb[160].mxu1 }
 0x83f   :  { %v3570_v26 = vpop.f32.mrb[137].mxu0  ;;  %v3820_v21 = vpop.f32.mrb[161].mxu1 }
 0x840   :  { %v3010_v10 = vpack.c.bf16 %v2980_v22, %v2977_v16  ;;  %v3571_v24 = vadd.f32 %v3570_v26, %v3569_v23  ;;  %v3572_v28 = vpop.f32.mrb[138].mxu0  ;;  %v2987_v30 = vpop.f32.mrb[162].mxu1 }
 0x841   :  { %v3573_v32 = vpop.f32.mrb[139].mxu0  ;;  %v3821_v34 = vpop.f32.mrb[163].mxu1 }
 0x842   :  { %v2897_v37 = vadd.f32 %v3571_v24, %v5243_v48  ;;  %v3574_v36 = vadd.f32 %v3573_v32, %v3572_v28  ;;  %3837 = vmatpush3.bf16.msra.mxu0 %v3010_v10  ;;  %v3351_v32 = vld [vmem:[%s5301_s3 + $0x6] ss:$0 sm:$0xff] }
 0x843   :  { %3838 = vmatprep.subr.bf16.mxu0 %v4149_v0 }
 0x844   :  { %v2985_v38 = vadd.f32 %v2984_v61, %v2897_v37  ;;  %v2900_v44 = vadd.f32 %v3574_v36, %v5245_v52  ;;  %v3352_v37 = vld [vmem:[%s5301_s3 + $0x7] ss:$0 sm:$0xff] }
 0x846   :  { %v2988_v40 = vadd.f32 %v2987_v30, %v2900_v44  ;;  %v3575_v45 = vpop.f32.mrb[140].mxu0  ;;  %v2992_v46 = vpop.f32.mrb[164].mxu1 }
 0x847   :  { %v3576_v47 = vpop.f32.mrb[141].mxu0  ;;  %v3824_v17 = vpop.f32.mrb[165].mxu1 }
 0x848   :  { %v3011_v25 = vpack.c.bf16 %v2988_v40, %v2985_v38  ;;  %v3577_v33 = vadd.f32 %v3576_v47, %v3575_v45  ;;  %v3578_v59 = vpop.f32.mrb[142].mxu0  ;;  %v2995_v11 = vpop.f32.mrb[166].mxu1 }
 0x849   :  { %v3579_v35 = vpop.f32.mrb[143].mxu0  ;;  %v3825_v41 = vpop.f32.mrb[167].mxu1 }
 0x84a   :  { %v2905_v48 = vadd.f32 %v3577_v33, %v5247_v53  ;;  %v3580_v58 = vadd.f32 %v3579_v35, %v3578_v59  ;;  %3839 = vmatpush3.bf16.msra.mxu0 %v3011_v25 }
 0x84b   :  { %3840 = vmatprep.subr.bf16.mxu0 %v4149_v0 }
 0x84c   :  { %v2993_v60 = vadd.f32 %v2992_v46, %v2905_v48  ;;  %v2908_v52 = vadd.f32 %v3580_v58, %v5249_v63 }
 0x84e   :  { %v2996_v43 = vadd.f32 %v2995_v11, %v2908_v52  ;;  %v3581_v51 = vpop.f32.mrb[144].mxu0  ;;  %v3000_v54 = vpop.f32.mrb[168].mxu1 }
 0x84f   :  { %v3582_v56 = vpop.f32.mrb[145].mxu0  ;;  %v3828_v57 = vpop.f32.mrb[169].mxu1 }
 0x850   :  { %v3012_v1 = vpack.c.bf16 %v2996_v43, %v2993_v60  ;;  %v3583_v2 = vadd.f32 %v3582_v56, %v3581_v51  ;;  %v3584_v3 = vpop.f32.mrb[146].mxu0  ;;  %v3003_v4 = vpop.f32.mrb[170].mxu1 }
 0x851   :  { %v3585_v12 = vpop.f32.mrb[147].mxu0  ;;  %v3829_v13 = vpop.f32.mrb[171].mxu1 }
 0x852   :  { %v2913_v53 = vadd.f32 %v3583_v2, %v5251_v20  ;;  %3841 = vmatpush3.bf16.msra.mxu0 %v3012_v1 }
 0x853   :  { %3842 = vmatprep.subr.bf16.mxu0 %v4149_v0 }
 0x854   :  { %v3001_v6 = vadd.f32 %v3000_v54, %v2913_v53 }
 0x856   :  { %v3013_v14 = vpack.c.bf16 %v3001_v6, %v3001_v6 }
 0x858   :  { %v3018_v63 = vsel %vm281_vm1, %v3013_v14, 0 }
 0x859   :  { %3843 = vmatpush3.bf16.msra.mxu0 %v3018_v63 }
 0x85c   :  { %3845 = vmatmul.mubr.msk.bf16.vlgmr.msra.gmra.mrb[148].mxu0 %vm277_vm2, %v3006_v55 }
 0x92f   :  { %v3054_v18 = vpop.f32.mrb[148].mxu0 }
 0x930   :  { %v3063_v5 = vsel %vm3062_vm3, %v3054_v18, 0.0  ;;  %v3071_v9 = vmul.f32 %v3054_v18, %v3054_v18  ;;  %v3846_v20 = vpop.f32.mrb[149].mxu0 }
 0x931   :  { %v3064_v8 = vrot.slane %v3063_v5, 4  ;;  %v3057_v15 = vpop.f32.mrb[150].mxu0 }
 0x932   :  { %v3072_v0 = vsel %vm3062_vm3, %v3071_v9, 0.0  ;;  %v3847_v29 = vpop.f32.mrb[151].mxu0 }
 0x933   :  { %v3065_v31 = vadd.f32 %v3064_v8, %v3063_v5  ;;  %v3073_v39 = vrot.slane %v3072_v0, 4 }
 0x935   :  { %v3066_v42 = vrot.slane %v3065_v31, 2  ;;  %v3074_v19 = vadd.f32 %v3073_v39, %v3072_v0 }
 0x937   :  { %v3067_v27 = vadd.f32 %v3066_v42, %v3065_v31  ;;  %v3075_v50 = vrot.slane %v3074_v19, 2 }
 0x939   :  { %v3068_v62 = vrot.slane %v3067_v27, 1  ;;  %v3076_v49 = vadd.f32 %v3075_v50, %v3074_v19 }
 0x93b   :  { %v3069_v16 = vadd.f32 %v3068_v62, %v3067_v27  ;;  %v3077_v7 = vrot.slane %v3076_v49, 1 }
 0x93d   :  { %v3070_v22 = vmul.f32 0.25, %v3069_v16  ;;  %v3078_v23 = vadd.f32 %v3077_v7, %v3076_v49 }
 0x93f   :  { %v3079_v61 = vmul.f32 0.25, %v3078_v23  ;;  %v3080_v26 = vmul.f32 %v3070_v22, %v3070_v22  ;;  %v3083_v28 = vsub.f32 %v3054_v18, %v3070_v22 }
 0x941   :  { %v3081_v21 = vsub.f32 %v3079_v61, %v3080_v26 }
 0x943   :  { %v3082_v10 = vmax.f32 %v3081_v21, 0.0 }
 0x945   :  { %v3084_v24 = vadd.f32 1e-05, %v3082_v10 }
 0x947   :  { %4096 = vrsqrt.f32 %v3084_v24 }
 0x951   :  { %v4097_v30 = vpop.eup %4096 }
 0x952   :  { %v3086_v34 = vmul.f32 %v4097_v30, %v3083_v28 }
 0x954   :  { %v3091_v36 = vmul.f32 %v3351_v32, %v3086_v34 }
 0x956   :  { %v3096_v38 = vadd.f32 %v3352_v37, %v3091_v36 }
 0x958   :  { %v3097_v44 = vmax.f32 %v3096_v38, 0.0 }
 0x95a   :  { %3098 = vst.msk [vmem:[#allocation5] sm:$0xf] %vm3062_vm3, %v3097_v44 }
 0x95b   :  { %4131 = shalt.err (!%p4128_p12)
}
 0x95c   :  { %s4132_s8 = scalar_lea.hbm %s5305_s7, 64 }
 0x95d   :  { %p4133_p13 = scmp.ne.s32.totalorder %s5305_s7, %s4132_s8  ;;  %p4136_p0 = scmp.lt.u32.totalorder %s4132_s8, %s5305_s7 }
 0x95f   :  { %p4138_p1 = pnand %p4136_p0, %p4133_p13 }
 0x961   :  { %4141 = shalt.err (!%p4138_p1)
}
 0x962   :  { %3108 = dma.vmem_to_hbm [thread:$0]  %s3106_s28, 64, %s5305_s7, [#allocation4]  }
 0x963   :  { %4144 = dma.done.wait [#allocation4], 64  }
 0x964   :  { %4145 = vsyncadd [#allocation4], 4294967232 }
 0x965   :  { %3112 = vsyncpa [#allocation3], 1 }
 0x966   :  { %3113 = vsyncpa [#allocation4], 1 }

</bundles_post_ra>
